<compile_context>
chip_gen: v7x
topology: tpu7x:2x2x1
jax: 0.10.0
libtpu: 0.0.40
codegen_flags: <defaults>
</compile_context>

<pallas_src>
import functools
import math

import jax
import jax.numpy as jnp
from jax import lax
from jax.experimental import pallas as pl
from jax.experimental.pallas import tpu as pltpu


def _round_up(x, m):
    return ((x + m - 1) // m) * m


def _vmem_capacity_bytes():
    """Per-TensorCore VMEM capacity; conservative 64 MiB fallback (v7x)."""
    try:
        info = pltpu.get_tpu_info()
        cap = getattr(info, "vmem_capacity_bytes", None)
        if cap:
            return int(cap)
    except Exception:
        pass
    return 64 * 1024 * 1024


def _pick_group_batch(G, Mp, Np, io_itemsize, vmem_cap):
    """Largest divisor of G whose batched per-step footprint fits the budget.

    Budget scales with the generation's VMEM (so v5e/v6e use their headroom),
    and Gb is capped so the parallel grid keeps >= 2 steps whenever G >= 2
    (feeds both TensorCores on v7x; costs ~nothing on single-TC parts).
    """
    budget = max(8 * 1024 * 1024, vmem_cap // 6)
    per_group = (4 * Mp * Np * io_itemsize      # double-buffered in + out blocks
                 + 4 * Mp * Np * 4              # f32 MxN temporaries (Z, Zc, W, ...)
                 + 9 * Np * Np * 4)             # f32 NxN temporaries (S, B, B2, B3, ...)
    gb = int(max(1, min(G, budget // max(per_group, 1))))
    if G >= 2:
        gb = min(gb, G // 2)                    # keep >= 2 grid steps
    gb = max(gb, 1)
    while G % gb != 0:
        gb -= 1
    return gb


def _oni_colum_kernel(T, eps, n_true, use_bf16_mm, use_bf16_newton,
                      z_ref, w_ref):
    # z_ref / w_ref blocks: (Gb, Mp, Np), padded & sublane/lane aligned.
    Gb, Mp, Np = z_ref.shape
    mm_dtype = jnp.bfloat16 if use_bf16_mm else jnp.float32
    nw_dtype = jnp.bfloat16 if use_bf16_newton else jnp.float32

    Z = z_ref[...].astype(jnp.float32)                        # (Gb, Mp, Np)

    # Center each row over the TRUE N columns.  Padded columns of Z are zero,
    # so sum(Z) already equals the true row sum; after subtracting the mean we
    # mask padded columns back to exactly zero so they do not pollute S.
    mean = jnp.sum(Z, axis=-1, keepdims=True) * (1.0 / n_true)
    col_ids = lax.broadcasted_iota(jnp.int32, (1, Np), 1)
    col_mask = (col_ids < n_true).astype(jnp.float32)[None]   # (1, 1, Np)
    Zc = (Z - mean) * col_mask                                 # (Gb, Mp, Np)

    # Gram matrix S = Zc^T @ Zc per group: contract the sublane (M) axis of
    # both operands -> MXU transposed-LHS path, no explicit transpose of Zc.
    Zc_mm = Zc.astype(mm_dtype)
    S = lax.dot_general(Zc_mm, Zc_mm,
                        dimension_numbers=(((1,), (1,)), ((0,), (0,))),
                        preferred_element_type=jnp.float32)    # (Gb, Np, Np)

    # Identity / eps only on the REAL NxN diagonal.  The padded block of S is
    # already exactly zero (padded rows/cols of Zc are zero), so with a
    # real-only identity the padded block of every Newton iterate B stays
    # exactly zero as well, and ||S||_F is unaffected by padding.
    row = lax.broadcasted_iota(jnp.int32, (Np, Np), 0)
    col = lax.broadcasted_iota(jnp.int32, (Np, Np), 1)
    eye_real = ((row == col) & (row < n_true)).astype(jnp.float32)
    S = S + eps * eye_real[None]

    norm_S = jnp.sqrt(jnp.sum(S * S, axis=(1, 2), keepdims=True))  # (Gb,1,1)

    def bmm(a, b):
        return lax.dot_general(a.astype(nw_dtype), b.astype(nw_dtype),
                               dimension_numbers=(((2,), (1,)), ((0,), (0,))),
                               preferred_element_type=jnp.float32)

    # Newton-Schulz: B_{t+1} = 1.5*B_t - 0.5*(B_t^3) @ S  (S NOT
    # pre-normalized, exactly matching the reference; only the final output is
    # scaled).  First iteration is peeled: B0 = I  =>  B1 = 1.5*I - 0.5*S,
    # computed elementwise (exact, no MXU work).  Remaining T-1 iterations run
    # in f32 (or bf16 operands with f32 accumulation if requested); T is
    # static so the loop is unrolled.
    if T >= 1:
        B = 1.5 * eye_real[None] - 0.5 * S                     # (Gb, Np, Np)
        for _ in range(T - 1):
            B2 = bmm(B, B)
            B3 = bmm(B2, B)
            B = 1.5 * B - 0.5 * bmm(B3, S)
    else:
        B = jnp.broadcast_to(eye_real[None], (Gb, Np, Np))

    # Fold 1/sqrt(norm_S) into the (Np,Np) matrix (EUP rsqrt + N*N multiplies)
    # instead of dividing the (Mp,Np) output (fewer VPU ops since M >= N).
    scale = lax.rsqrt(norm_S)                                  # (Gb, 1, 1)
    Bs = (B * scale).astype(mm_dtype)

    W = lax.dot_general(Zc_mm, Bs,
                        dimension_numbers=(((2,), (1,)), ((0,), (0,))),
                        preferred_element_type=jnp.float32)    # (Gb, Mp, Np)
    w_ref[...] = W.astype(w_ref.dtype)


def oni_norm_colum(weight, *, T=5, norm_groups=1, eps=1e-5,
                   use_bf16_matmuls=False, use_bf16_newton=False):
    """Pallas implementation of ONINorm_colum.forward(weight)."""
    assert weight.shape[0] % norm_groups == 0
    G = norm_groups
    M = weight.shape[0] // G
    N = math.prod(weight.shape[1:]) if weight.ndim > 1 else 1
    Z = weight.reshape(G, M, N)

    # Pad to full sublane/lane tiles: lane-dense stores + full MXU tiles.
    Mp = _round_up(M, 8)
    Np = _round_up(N, 128)
    if (Mp, Np) != (M, N):
        Z = jnp.pad(Z, ((0, 0), (0, Mp - M), (0, Np - N)))

    vmem_cap = _vmem_capacity_bytes()
    io_itemsize = jnp.dtype(weight.dtype).itemsize
    Gb = _pick_group_batch(G, Mp, Np, io_itemsize, vmem_cap)
    grid = (G // Gb,)

    kernel = functools.partial(_oni_colum_kernel, T, eps, N,
                               use_bf16_matmuls, use_bf16_newton)

    # VMEM budget: double-buffered in/out blocks + f32 temporaries.  Clamp to
    # the generation's physical per-TC capacity minus headroom (v7x: 64 MiB).
    block_io_bytes = Gb * Mp * Np * io_itemsize
    block_f32_bytes = Gb * Mp * Np * 4
    nn_bytes = Gb * Np * Np * 4
    vmem_bytes = 4 * block_io_bytes + 4 * block_f32_bytes + 8 * nn_bytes
    vmem_bytes = max(int(vmem_bytes * 1.25), 32 * 1024 * 1024)
    vmem_bytes = min(vmem_bytes,
                     max(vmem_cap - 8 * 1024 * 1024, 32 * 1024 * 1024))

    # Advisory cost so XLA schedules surrounding ops sensibly.
    newton_mms = 3 * max(T - 1, 0)
    flops = G * (2 * (2 * Mp * Np * Np) + newton_mms * (2 * Np ** 3))
    cost = pl.CostEstimate(
        flops=flops,
        transcendentals=2 * G,  # sqrt + rsqrt per group
        bytes_accessed=2 * G * Mp * Np * io_itemsize,
    )

    W = pl.pallas_call(
        kernel,
        out_shape=jax.ShapeDtypeStruct((G, Mp, Np), weight.dtype),
        grid_spec=pltpu.PrefetchScalarGridSpec(
            num_scalar_prefetch=0,
            grid=grid,
            in_specs=[pl.BlockSpec((Gb, Mp, Np), lambda g: (g, 0, 0))],
            out_specs=pl.BlockSpec((Gb, Mp, Np), lambda g: (g, 0, 0)),
        ),
        compiler_params=pltpu.CompilerParams(
            dimension_semantics=("parallel",),
            vmem_limit_bytes=vmem_bytes,
        ),
        cost_estimate=cost,
    )(Z)

    # TODO(synk): for very large layers with heavy lane padding, write the
    # un-padded (G, M, N) output directly (masked stores) to save HBM traffic.
    W = W[:, :M, :N]
    return W.reshape(weight.shape)


def _oni_norm_colum_ref(weight, *, T=5, norm_groups=1, eps=1e-5):
    """Pure-JAX reference mirroring the PyTorch forward, for verification."""
    G = norm_groups
    Z = weight.reshape(G, weight.shape[0] // G, -1).astype(jnp.float32)
    Zc = Z - Z.mean(axis=-1, keepdims=True)
    S = jnp.einsum("gmn,gmk->gnk", Zc, Zc)
    eye = jnp.eye(S.shape[-1], dtype=jnp.float32)[None]
    S = S + eps * eye
    norm_S = jnp.sqrt(jnp.sum(S * S, axis=(1, 2), keepdims=True))
    B = jnp.broadcast_to(eye, S.shape)
    for _ in range(T):
        B3 = B @ B @ B
        B = 1.5 * B - 0.5 * (B3 @ S)
    W = (Zc @ B) / jnp.sqrt(norm_S)
    return W.reshape(weight.shape).astype(weight.dtype)


if __name__ == "__main__":
    key = jax.random.PRNGKey(0)
    k1, k2 = jax.random.split(key)

    # Test 1: conv-style weight with non-aligned N (=36) and tiny M (=4):
    # exercises lane/sublane padding + column masking, grid of 2 steps.
    w1 = 0.1 * jax.random.normal(k1, (8, 4, 3, 3), dtype=jnp.float32)
    out1 = jax.block_until_ready(oni_norm_colum(w1, T=5, norm_groups=2))
    ref1 = jax.block_until_ready(_oni_norm_colum_ref(w1, T=5, norm_groups=2))
    assert out1.shape == w1.shape and out1.dtype == w1.dtype
    assert jnp.allclose(out1, ref1, rtol=2e-4, atol=2e-5), \
        "Pallas result mismatch vs reference (test 1)"

    # Test 2: already lane/sublane aligned shape (M=8, N=128) per group.
    w2 = 0.05 * jax.random.normal(k2, (16, 32, 2, 2), dtype=jnp.float32)
    out2 = jax.block_until_ready(oni_norm_colum(w2, T=5, norm_groups=2))
    ref2 = jax.block_until_ready(_oni_norm_colum_ref(w2, T=5, norm_groups=2))
    assert out2.shape == w2.shape and out2.dtype == w2.dtype
    assert jnp.allclose(out2, ref2, rtol=2e-4, atol=2e-5), \
        "Pallas result mismatch vs reference (test 2)"

    # Test 3: optional bf16 MXU operands (M-contraction and Newton matmuls),
    # f32 accumulation / combine; loose tolerance for the bf16 fast path.
    out3 = jax.block_until_ready(
        oni_norm_colum(w1, T=5, norm_groups=2,
                       use_bf16_matmuls=True, use_bf16_newton=True))
    assert bool(jnp.all(jnp.isfinite(out3)))
    max_err = float(jnp.max(jnp.abs(out3 - ref1)))
    assert max_err < 5e-2 * (1.0 + float(jnp.max(jnp.abs(ref1)))), \
        "bf16 fast path deviates too much from f32 reference"

    print("KERNEL_OK")
</pallas_src>

<mosaic_0001>
module attributes {stable_mosaic.version = 11 : i64} {
  func.func @_oni_colum_kernel(%arg0: i32, %arg1: memref<1x8x128xf32, #tpu.memory_space<vmem>>, %arg2: memref<1x8x128xf32, #tpu.memory_space<vmem>>) attributes {dimension_semantics = [#tpu.dimension_semantics<parallel>], iteration_bounds = array<i64: 2>, scalar_prefetch = 0 : i64, scratch_operands = 0 : i64, tpu.core_type = #tpu.core_type<tc>, window_params = [{transform_indices = @transform_0, window_bounds = array<i64: 1, 8, 128>}, {transform_indices = @transform_1, window_bounds = array<i64: 1, 8, 128>}]} {
    %c0 = arith.constant 0 : index
    %c0_0 = arith.constant 0 : index
    %c0_1 = arith.constant 0 : index
    %0 = vector.load %arg1[%c0, %c0_0, %c0_1] : memref<1x8x128xf32, #tpu.memory_space<vmem>>, vector<1x8x128xf32>
    %cst = arith.constant dense<0.000000e+00> : vector<1x8xf32>
    %1 = vector.multi_reduction <add>, %0, %cst [2] : vector<1x8x128xf32> to vector<1x8xf32>
    %2 = vector.shape_cast %1 : vector<1x8xf32> to vector<1x8x1xf32>
    %cst_2 = arith.constant 0.027777778 : f32
    %3 = vector.broadcast %cst_2 : f32 to vector<1x8x1xf32>
    %4 = arith.mulf %2, %3 : vector<1x8x1xf32>
    %5 = tpu.iota {dimensions = array<i32: 1>} : vector<1x128xi32>
    %c36_i32 = arith.constant 36 : i32
    %6 = vector.broadcast %c36_i32 : i32 to vector<1x128xi32>
    %7 = arith.cmpi slt, %5, %6 : vector<1x128xi32>
    %8 = arith.extui %7 : vector<1x128xi1> to vector<1x128xi32>
    %9 = arith.sitofp %8 : vector<1x128xi32> to vector<1x128xf32>
    %10 = vector.shape_cast %9 : vector<1x128xf32> to vector<1x1x128xf32>
    %11 = vector.broadcast %4 : vector<1x8x1xf32> to vector<1x8x128xf32>
    %12 = arith.subf %0, %11 : vector<1x8x128xf32>
    %13 = vector.broadcast %10 : vector<1x1x128xf32> to vector<1x8x128xf32>
    %14 = arith.mulf %12, %13 : vector<1x8x128xf32>
    %cst_3 = arith.constant dense<0.000000e+00> : vector<1x128x128xf32>
    %15 = tpu.matmul %14, %14, %cst_3 {dimension_numbers = #tpu.dot_dimension_numbers<[1], [1], [2], [2], [0, 0, 0, 2, 1, 2], [0], [0]>} : vector<1x8x128xf32>, vector<1x8x128xf32>, vector<1x128x128xf32> -> vector<1x128x128xf32>
    %16 = tpu.iota {dimensions = array<i32: 0>} : vector<128x128xi32>
    %17 = tpu.iota {dimensions = array<i32: 1>} : vector<128x128xi32>
    %18 = arith.cmpi eq, %16, %17 : vector<128x128xi32>
    %c36_i32_4 = arith.constant 36 : i32
    %19 = vector.broadcast %c36_i32_4 : i32 to vector<128x128xi32>
    %20 = arith.cmpi slt, %16, %19 : vector<128x128xi32>
    %21 = arith.andi %18, %20 : vector<128x128xi1>
    %22 = arith.extui %21 : vector<128x128xi1> to vector<128x128xi32>
    %23 = arith.sitofp %22 : vector<128x128xi32> to vector<128x128xf32>
    %24 = vector.shape_cast %23 : vector<128x128xf32> to vector<1x128x128xf32>
    %cst_5 = arith.constant 9.99999974E-6 : f32
    %25 = vector.broadcast %cst_5 : f32 to vector<1x128x128xf32>
    %26 = arith.mulf %25, %24 : vector<1x128x128xf32>
    %27 = arith.addf %15, %26 : vector<1x128x128xf32>
    %28 = arith.mulf %27, %27 : vector<1x128x128xf32>
    %cst_6 = arith.constant dense<0.000000e+00> : vector<1xf32>
    %29 = vector.multi_reduction <add>, %28, %cst_6 [1, 2] : vector<1x128x128xf32> to vector<1xf32>
    %30 = vector.shape_cast %29 : vector<1xf32> to vector<1x1x1xf32>
    %31 = math.sqrt %30 : vector<1x1x1xf32>
    %32 = vector.shape_cast %23 : vector<128x128xf32> to vector<1x128x128xf32>
    %cst_7 = arith.constant 1.500000e+00 : f32
    %33 = vector.broadcast %cst_7 : f32 to vector<1x128x128xf32>
    %34 = arith.mulf %33, %32 : vector<1x128x128xf32>
    %cst_8 = arith.constant 5.000000e-01 : f32
    %35 = vector.broadcast %cst_8 : f32 to vector<1x128x128xf32>
    %36 = arith.mulf %35, %27 : vector<1x128x128xf32>
    %37 = arith.subf %34, %36 : vector<1x128x128xf32>
    %cst_9 = arith.constant dense<0.000000e+00> : vector<1x128x128xf32>
    %38 = tpu.matmul %37, %37, %cst_9 {dimension_numbers = #tpu.dot_dimension_numbers<[2], [1], [1], [2], [0, 0, 0, 1, 1, 2], [0], [0]>} : vector<1x128x128xf32>, vector<1x128x128xf32>, vector<1x128x128xf32> -> vector<1x128x128xf32>
    %cst_10 = arith.constant dense<0.000000e+00> : vector<1x128x128xf32>
    %39 = tpu.matmul %38, %37, %cst_10 {dimension_numbers = #tpu.dot_dimension_numbers<[2], [1], [1], [2], [0, 0, 0, 1, 1, 2], [0], [0]>} : vector<1x128x128xf32>, vector<1x128x128xf32>, vector<1x128x128xf32> -> vector<1x128x128xf32>
    %cst_11 = arith.constant 1.500000e+00 : f32
    %40 = vector.broadcast %cst_11 : f32 to vector<1x128x128xf32>
    %41 = arith.mulf %40, %37 : vector<1x128x128xf32>
    %cst_12 = arith.constant dense<0.000000e+00> : vector<1x128x128xf32>
    %42 = tpu.matmul %39, %27, %cst_12 {dimension_numbers = #tpu.dot_dimension_numbers<[2], [1], [1], [2], [0, 0, 0, 1, 1, 2], [0], [0]>} : vector<1x128x128xf32>, vector<1x128x128xf32>, vector<1x128x128xf32> -> vector<1x128x128xf32>
    %cst_13 = arith.constant 5.000000e-01 : f32
    %43 = vector.broadcast %cst_13 : f32 to vector<1x128x128xf32>
    %44 = arith.mulf %43, %42 : vector<1x128x128xf32>
    %45 = arith.subf %41, %44 : vector<1x128x128xf32>
    %cst_14 = arith.constant dense<0.000000e+00> : vector<1x128x128xf32>
    %46 = tpu.matmul %45, %45, %cst_14 {dimension_numbers = #tpu.dot_dimension_numbers<[2], [1], [1], [2], [0, 0, 0, 1, 1, 2], [0], [0]>} : vector<1x128x128xf32>, vector<1x128x128xf32>, vector<1x128x128xf32> -> vector<1x128x128xf32>
    %cst_15 = arith.constant dense<0.000000e+00> : vector<1x128x128xf32>
    %47 = tpu.matmul %46, %45, %cst_15 {dimension_numbers = #tpu.dot_dimension_numbers<[2], [1], [1], [2], [0, 0, 0, 1, 1, 2], [0], [0]>} : vector<1x128x128xf32>, vector<1x128x128xf32>, vector<1x128x128xf32> -> vector<1x128x128xf32>
    %cst_16 = arith.constant 1.500000e+00 : f32
    %48 = vector.broadcast %cst_16 : f32 to vector<1x128x128xf32>
    %49 = arith.mulf %48, %45 : vector<1x128x128xf32>
    %cst_17 = arith.constant dense<0.000000e+00> : vector<1x128x128xf32>
    %50 = tpu.matmul %47, %27, %cst_17 {dimension_numbers = #tpu.dot_dimension_numbers<[2], [1], [1], [2], [0, 0, 0, 1, 1, 2], [0], [0]>} : vector<1x128x128xf32>, vector<1x128x128xf32>, vector<1x128x128xf32> -> vector<1x128x128xf32>
    %cst_18 = arith.constant 5.000000e-01 : f32
    %51 = vector.broadcast %cst_18 : f32 to vector<1x128x128xf32>
    %52 = arith.mulf %51, %50 : vector<1x128x128xf32>
    %53 = arith.subf %49, %52 : vector<1x128x128xf32>
    %cst_19 = arith.constant dense<0.000000e+00> : vector<1x128x128xf32>
    %54 = tpu.matmul %53, %53, %cst_19 {dimension_numbers = #tpu.dot_dimension_numbers<[2], [1], [1], [2], [0, 0, 0, 1, 1, 2], [0], [0]>} : vector<1x128x128xf32>, vector<1x128x128xf32>, vector<1x128x128xf32> -> vector<1x128x128xf32>
    %cst_20 = arith.constant dense<0.000000e+00> : vector<1x128x128xf32>
    %55 = tpu.matmul %54, %53, %cst_20 {dimension_numbers = #tpu.dot_dimension_numbers<[2], [1], [1], [2], [0, 0, 0, 1, 1, 2], [0], [0]>} : vector<1x128x128xf32>, vector<1x128x128xf32>, vector<1x128x128xf32> -> vector<1x128x128xf32>
    %cst_21 = arith.constant 1.500000e+00 : f32
    %56 = vector.broadcast %cst_21 : f32 to vector<1x128x128xf32>
    %57 = arith.mulf %56, %53 : vector<1x128x128xf32>
    %cst_22 = arith.constant dense<0.000000e+00> : vector<1x128x128xf32>
    %58 = tpu.matmul %55, %27, %cst_22 {dimension_numbers = #tpu.dot_dimension_numbers<[2], [1], [1], [2], [0, 0, 0, 1, 1, 2], [0], [0]>} : vector<1x128x128xf32>, vector<1x128x128xf32>, vector<1x128x128xf32> -> vector<1x128x128xf32>
    %cst_23 = arith.constant 5.000000e-01 : f32
    %59 = vector.broadcast %cst_23 : f32 to vector<1x128x128xf32>
    %60 = arith.mulf %59, %58 : vector<1x128x128xf32>
    %61 = arith.subf %57, %60 : vector<1x128x128xf32>
    %cst_24 = arith.constant dense<0.000000e+00> : vector<1x128x128xf32>
    %62 = tpu.matmul %61, %61, %cst_24 {dimension_numbers = #tpu.dot_dimension_numbers<[2], [1], [1], [2], [0, 0, 0, 1, 1, 2], [0], [0]>} : vector<1x128x128xf32>, vector<1x128x128xf32>, vector<1x128x128xf32> -> vector<1x128x128xf32>
    %cst_25 = arith.constant dense<0.000000e+00> : vector<1x128x128xf32>
    %63 = tpu.matmul %62, %61, %cst_25 {dimension_numbers = #tpu.dot_dimension_numbers<[2], [1], [1], [2], [0, 0, 0, 1, 1, 2], [0], [0]>} : vector<1x128x128xf32>, vector<1x128x128xf32>, vector<1x128x128xf32> -> vector<1x128x128xf32>
    %cst_26 = arith.constant 1.500000e+00 : f32
    %64 = vector.broadcast %cst_26 : f32 to vector<1x128x128xf32>
    %65 = arith.mulf %64, %61 : vector<1x128x128xf32>
    %cst_27 = arith.constant dense<0.000000e+00> : vector<1x128x128xf32>
    %66 = tpu.matmul %63, %27, %cst_27 {dimension_numbers = #tpu.dot_dimension_numbers<[2], [1], [1], [2], [0, 0, 0, 1, 1, 2], [0], [0]>} : vector<1x128x128xf32>, vector<1x128x128xf32>, vector<1x128x128xf32> -> vector<1x128x128xf32>
    %cst_28 = arith.constant 5.000000e-01 : f32
    %67 = vector.broadcast %cst_28 : f32 to vector<1x128x128xf32>
    %68 = arith.mulf %67, %66 : vector<1x128x128xf32>
    %69 = arith.subf %65, %68 : vector<1x128x128xf32>
    %70 = math.rsqrt %31 : vector<1x1x1xf32>
    %71 = vector.broadcast %70 : vector<1x1x1xf32> to vector<1x128x128xf32>
    %72 = arith.mulf %69, %71 : vector<1x128x128xf32>
    %cst_29 = arith.constant dense<0.000000e+00> : vector<1x8x128xf32>
    %73 = tpu.matmul %14, %72, %cst_29 {dimension_numbers = #tpu.dot_dimension_numbers<[2], [1], [1], [2], [0, 0, 0, 1, 1, 2], [0], [0]>} : vector<1x8x128xf32>, vector<1x128x128xf32>, vector<1x8x128xf32> -> vector<1x8x128xf32>
    %c0_30 = arith.constant 0 : index
    %c0_31 = arith.constant 0 : index
    %c0_32 = arith.constant 0 : index
    %74 = vector.load %arg2[%c0_30, %c0_31, %c0_32] : memref<1x8x128xf32, #tpu.memory_space<vmem>>, vector<1x8x128xf32>
    tpu.vector_store %arg2[%c0_30, %c0_31, %c0_32], %73 {strides = array<i32>} : memref<1x8x128xf32, #tpu.memory_space<vmem>>, vector<1x8x128xf32>,
    return
  }
  func.func @transform_0(%arg0: i32) -> (i32, i32, i32) {
    %c0_i32 = arith.constant 0 : i32
    %c0_i32_0 = arith.constant 0 : i32
    %c0_i32_1 = arith.constant 0 : i32
    return %arg0, %c0_i32, %c0_i32_0 : i32, i32, i32
  }
  func.func @transform_1(%arg0: i32) -> (i32, i32, i32) {
    %c0_i32 = arith.constant 0 : i32
    %c0_i32_0 = arith.constant 0 : i32
    %c0_i32_1 = arith.constant 0 : i32
    return %arg0, %c0_i32, %c0_i32_0 : i32, i32, i32
  }
}

</mosaic_0001>

<bundles_post_ra>
// kernel: tpu_custom_call.1
= control target key start
LH: loop header
LB: loop body
LE: loop exit
PB: predicated region body
PF: predicated region fallthrough
CT: control target
= control target key end

     0   :  { %6 = vsyncpa [#allocation3], 0  ;;  %s5067_s0 = inlined_call_operand.hbm [shape: f32[2,8,128], index: 0, kind: input, shape index: {}]   ;;  %s5068_s1 = inlined_call_operand.hbm [shape: f32[2,8,128], index: 1, kind: output, shape index: {}]  }
   0x1   :  { %8 = vsyncpa [#allocation3 + $0x1], 0 }
   0x2   :  { %9 = vsyncpa [#allocation4], 0 }
   0x3   :  { %11 = vsyncpa [#allocation4 + $0x1], 0  ;;  %s4439_s6 = smov 0   ;;  %s4441_s7 = smov 0  }
   0x4   :  { %s4443_s8 = smov 0   ;;  %s4445_s9 = smov 0  }
   0x5 LB: > { %s4460_s10 = sadd.s32 4294967295, %s4422_s9   ;;  %s2680_s11 = sadd.s32 4294967294, %s4422_s9   ;;  %s4422_s9 = sphi %s4445_s9, %s5083_s9   ;;  %s4418_s8 = sphi %s4443_s8, %s5082_s8   ;;  %s4414_s7 = sphi %s4441_s7, %s5081_s7   ;;  %s4410_s6 = sphi %s4439_s6, %s5080_s6  }
   0x6   : > { %s4464_s12 = sadd.s32 1, %s4422_s9   ;;  %s24_s13 = sadd.s32 1, %s4418_s8 }
   0x7   : > { %s21_s14 = ssub.s32 %s4422_s9, %s4464_s12  ;;  %p31_p0 = scmp.ne.s32.totalorder %s4418_s8, %s4414_s7 }
   0x8   : > { %p22_p1 = scmp.eq.s32.totalorder %s21_s14, 0  ;;  %p32_p2 = scmp.eq.s32.totalorder %s4422_s9, 0 }
   0x9   : > { %p37_p3 = scmp.ne.s32.totalorder %s4414_s7, %s4410_s6  ;;  %p38_p4 = scmp.eq.s32.totalorder %s4460_s10, 0 }
   0xa   : > { %s4476_s15 = scalar_select %p22_p1, %s4418_s8, %s24_s13  }
   0xb   : > { %p4478_p5 = por %p32_p2, %p31_p0  ;;  %p4482_p6 = por %p38_p4, %p37_p3 }
   0xc   : > { %p61_p7 = scmp.eq.s32.totalorder %s4460_s10, 1  ;;  %p67_p8 = scmp.eq.s32.totalorder %s2680_s11, 1 }
   0xd   : > { %p4285_p10 = scmp.lt.s32.totalorder %s4422_s9, 2  ;;  %s87_s20 = sand.u32 1, %s4418_s8  }
   0xe   : > { %p4489_p11 = por %p61_p7, %p31_p0  ;;  %p4493_p12 = por %p67_p8, %p37_p3 }
   0xf   : > { %s2684_s21 = sshll.u32 %s4422_s9, 7  ;;  %s2683_s22 = sshll.u32 %s87_s20, 3 }
  0x10   : > { %s5072_s18 = scalar_select %p4489_p11, 1, 0 }
  0x11   : > { %s5073_s19 = scalar_select %p4493_p12, 1, 0 }
  0x12   : > { %s4502_s25 = scalar_lea.hbm %s5067_s0, %s2684_s21  ;;  %s91_s26 = scalar_lea.vmem [#allocation2], %s2683_s22 }
  0x13   : > { %s98_s27 = sshll.u32 %s91_s26, 4  ;;  %p4506_p13 = pnand %p4285_p10, %p4478_p5  ;;  %s4510_s27 = int_to_ptr.vmem [resolvable:$true] %s98_s27 }
  0x14   : > { %s88_s29 = scalar_lea.sflag [#allocation3], %s87_s20  ;;  %s4326_s30 = scalar_lea.hbm %s4502_s25, 128 }
  0x15   : > { %p4327_p2 = scmp.ne.s32.totalorder %s4502_s25, %s4326_s30  ;;  %p4328_p3 = pneg %p4506_p13 }
  0x16   : > { %s4331_s4 = scalar_lea.hbm %s5067_s0, 256  ;;  %p4332_p5 = scmp.lt.u32.totalorder %s4502_s25, %s5067_s0 }
  0x17   : > { %p4329_p4 = pnand %p4328_p3, %p4327_p2  ;;  %p4333_p8 = scmp.lt.u32.totalorder %s4331_s4, %s4326_s30 }
  0x18   : > { %p4335_p9 = scmp.lt.u32.totalorder %s4326_s30, %s4502_s25 }
  0x19   : > { %p4330_p7 = pneg %p4329_p4  ;;  %p4334_p10 = por %p4333_p8, %p4332_p5 }
  0x1b   : > { %p4336_p0 = por %p4335_p9, %p4334_p10 }
  0x1d   : > { %p4337_p1 = pnand %p4336_p0, %p4330_p7 }
  0x1f   : > { %4340 = shalt.err (!%p4337_p1)
}
  0x20   : > { %s4341_s13 = scalar_lea.vmem %s4510_s27, 128  ;;  %s4424_s14 = smov [#allocation2]  }
  0x21   : > { %p4342_p2 = scmp.ne.s32.totalorder %s4510_s27, %s4341_s13  ;;  %s4346_s16 = sshll.u32 %s4424_s14, 4  ;;  %s4347_s16 = int_to_ptr.vmem [resolvable:$false] %s4346_s16 }
  0x22   : > { %s4348_s20 = scalar_lea.vmem %s4347_s16, 256  ;;  %p4349_p11 = scmp.lt.s32.totalorder %s4510_s27, %s4347_s16 }
  0x23   : > { %p4344_p4 = pnand %p4342_p2, %p4328_p3  ;;  %p4350_p5 = scmp.lt.s32.totalorder %s4348_s20, %s4341_s13 }
  0x25   : > { %p4345_p12 = pneg %p4344_p4  ;;  %p4351_p8 = por %p4350_p5, %p4349_p11 }
  0x27   : > { %p4352_p9 = pnand %p4351_p8, %p4345_p12 }
  0x29   : > { %4355 = shalt.err (!%p4352_p9)
}
  0x2a   : > { %4280 = dma.hbm_to_vmem [thread:$0]  (!%p4506_p13), %s4502_s25, 128, %s4510_s27, %s88_s29  }
  0x2b   : > { %p5075_p0 = scmp.lt.s32.totalorder %s4422_s9, 3  ;;  %p5076_p1 = scmp.ge.s32.totalorder %s4422_s9, 1 }
  0x2d   : > { %p104_p3 = pnand %p5076_p1, %p5075_p0 }
  0x2e   : > { %s4544_s21 = sand.u32 (!%p104_p3), 1, %s4414_s7  }
  0x2f   : > { %107 = sbr.rel (%p104_p3) target bundleno = 3559 (0xde7), region = 24  ;;  %s2686_s22 = sshll.u32 (!%p104_p3), %s4544_s21, 3 }
  0x30   : > { %s110_s23 = scalar_lea.sflag (!%p104_p3), [#allocation3], %s4544_s21  ;;  %s113_s24 = scalar_lea.vmem (!%p104_p3), [#allocation2], %s2686_s22 }
  0x36   : > { %4401 = dma.done.wait (%p4482_p6), %s110_s23, 128  }
  0x37   : > { %4403 = vsyncadd (%p4482_p6), %s110_s23, 4294967168  ;;  %v132_v0 = vld [vmem:[%s113_s24] sm:$0xff]  ;;  %v136_v1 = vlaneseq  ;;  %v4425_v5 = vmov 0.0   ;;  %vm288_vm1 = vcmask 64512   ;;  %vm4427_vm9 = vmmov 0   ;;  %s131_s17 = scalar_lea.vmem [#allocation5], %s2686_s22 }
  0x38   : > { %133 = vadd.xlane.f32.xlu0 %v132_v0  ;;  %s2610_s25 = sshll.u32 %s131_s17, 4  ;;  %s2711_s26 = sshll.u32 %s4460_s10, 7  ;;  %s5020_s25 = int_to_ptr.vmem [resolvable:$true] %s2610_s25 }
  0x39   : > { %v4554_v2 = vand.u32 127, %v136_v1  ;;  %v144_v25 = vshrl.u32 %v136_v1, 7  ;;  %s5025_s29 = scalar_lea.hbm %s5068_s1, %s2711_s26  ;;  %s2597_s30 = scalar_lea.sflag [#allocation4], %s4544_s21 }
  0x3a   : > { %s4356_s2 = scalar_lea.vmem %s5020_s25, 128  ;;  %p5077_p11 = scmp.ne.s32.totalorder %s5072_s18, 0 }
  0x3b   : > { %vm138_vm0 = vcmp.lt.s32.totalorder %v4554_v2, 36  ;;  %v145_v26 = vadd.s32 8, %v144_v25  ;;  %vm160_vm3 = vcmp.eq.s32.totalorder %v144_v25, %v4554_v2  ;;  %v147_v29 = vadd.s32 24, %v144_v25  ;;  %p4357_p6 = scmp.ne.s32.totalorder %s5020_s25, %s4356_s2  ;;  %s4428_s10 = smov [#allocation5]  }
  0x3c   : > { %v2688_v6 = vsel %vm138_vm0, 1.0, %v4425_v5  ;;  %v2689_v28 = vsel %vm160_vm3, 1.0, %v4425_v5  ;;  %v146_v30 = vadd.s32 16, %v144_v25  ;;  %v148_v37 = vadd.s32 32, %v144_v25  ;;  %s4360_s3 = sshll.u32 %s4428_s10, 4  ;;  %s4361_s3 = int_to_ptr.vmem [resolvable:$false] %s4360_s3 }
  0x3d   : > { %vm161_vm2 = vcmp.eq.s32.totalorder %v145_v26, %v4554_v2  ;;  %v240_v32 = vmul.f32 1e-05, %v2689_v28  ;;  %vm163_vm4 = vcmp.eq.s32.totalorder %v147_v29, %v4554_v2  ;;  %v528_v39 = vmul.f32 1.5, %v2689_v28  ;;  %p4358_p12 = pnand %p4357_p6, %p5077_p11  ;;  %s4362_s4 = scalar_lea.vmem %s4361_s3, 256 }
  0x3e   : > { %v2690_v27 = vsel %vm161_vm2, 1.0, %v4425_v5  ;;  %vm162_vm5 = vcmp.eq.s32.totalorder %v146_v30, %v4554_v2  ;;  %v2692_v40 = vsel %vm163_vm4, 1.0, %v4425_v5  ;;  %vm164_vm6 = vcmp.eq.s32.totalorder %v148_v37, %v4554_v2  ;;  %p4363_p7 = scmp.lt.s32.totalorder %s5020_s25, %s4361_s3  ;;  %p4364_p10 = scmp.lt.s32.totalorder %s4362_s4, %s4356_s2 }
  0x3f   : > { %v241_v31 = vmul.f32 1e-05, %v2690_v27  ;;  %v529_v35 = vmul.f32 1.5, %v2690_v27  ;;  %v2691_v43 = vsel %vm162_vm5, 1.0, %v4425_v5  ;;  %v243_v48 = vmul.f32 1e-05, %v2692_v40  ;;  %p4359_p13 = pneg %p4358_p12 }
  0x40   : > { %vm180_vm7 = vcmp.lt.s32.totalorder %v148_v37, 36  ;;  %v242_v51 = vmul.f32 1e-05, %v2691_v43  ;;  %v531_v55 = vmul.f32 1.5, %v2692_v40  ;;  %v530_v58 = vmul.f32 1.5, %v2691_v43  ;;  %p4365_p2 = por %p4364_p10, %p4363_p7 }
  0x41   : > { %vm196_vm8 = vmand %vm164_vm6, %vm180_vm7 }
  0x42   : > { %v2693_v60 = vsel %vm196_vm8, 1.0, %v4425_v5  ;;  %p4366_p4 = pnand %p4365_p2, %p4359_p13 }
  0xc5   : > { %v134_v3 = vpop.xlane.xlu0 %133 }
  0xc6   : > { %v135_v4 = vmul.f32 0.027777778, %v134_v3 }
  0xc8   : > { %v141_v7 = vsub.f32 %v132_v0, %v135_v4  ;;  %v244_v4 = vmul.f32 1e-05, %v2693_v60 }
  0xca   : > { %v4558_v8 = vmul.f32 %v2688_v6, %v141_v7 }
  0xcc   : > { %256 = vxpose.xlu0.b32.start.end [1/1] (short) %v4558_v8, 128  ;;  %3132 = vmatprep.subr.mxu0 %v4558_v8 }
  0xcd   : > { %3133 = vmatpush3.msra.mxu0 %v4558_v8 }
 0x14c   : > { %v272_v9 = vpop.trf.xlu0 }
 0x14d   : > { %3134 = vmatprep.mubr.msk.f32.mxu0 %vm288_vm1, %v272_v9 }
 0x150   : > { %v273_v10 = vpop.trf.xlu0 }
 0x151   : > { %3135 = vmatmul.mubr.msk.f32.vlgmr.msra.gmra.mrb[0].mxu0 %vm288_vm1, %v273_v10 }
 0x154   : > { %v274_v11 = vpop.trf.xlu0 }
 0x155   : > { %3137 = vmatprep.mubr.msk.f32.mxu0 %vm288_vm1, %v274_v11 }
 0x158   : > { %v275_v12 = vpop.trf.xlu0 }
 0x159   : > { %3138 = vmatmul.mubr.msk.f32.gmra.mrb[2].mxu0 %vm288_vm1, %v275_v12 }
 0x15c   : > { %v276_v13 = vpop.trf.xlu0 }
 0x15d   : > { %3140 = vmatprep.mubr.msk.f32.mxu0 %vm288_vm1, %v276_v13  ;;  %v532_v13 = vmul.f32 1.5, %v2693_v60 }
 0x160   : > { %v277_v14 = vpop.trf.xlu0 }
 0x161   : > { %3141 = vmatmul.mubr.msk.f32.gmra.mrb[4].mxu0 %vm288_vm1, %v277_v14 }
 0x164   : > { %v278_v15 = vpop.trf.xlu0 }
 0x165   : > { %3143 = vmatprep.mubr.msk.f32.mxu0 %vm288_vm1, %v278_v15 }
 0x168   : > { %v279_v16 = vpop.trf.xlu0 }
 0x169   : > { %3144 = vmatmul.mubr.msk.f32.gmra.mrb[6].mxu0 %vm288_vm1, %v279_v16 }
 0x16c   : > { %v280_v17 = vpop.trf.xlu0 }
 0x16d   : > { %3146 = vmatprep.mubr.msk.f32.mxu0 %vm288_vm1, %v280_v17 }
 0x170   : > { %v281_v18 = vpop.trf.xlu0 }
 0x171   : > { %3147 = vmatmul.mubr.msk.f32.gmra.mrb[8].mxu0 %vm288_vm1, %v281_v18 }
 0x174   : > { %v282_v19 = vpop.trf.xlu0 }
 0x175   : > { %3149 = vmatprep.mubr.msk.f32.mxu0 %vm288_vm1, %v282_v19 }
 0x178   : > { %v283_v20 = vpop.trf.xlu0 }
 0x179   : > { %3150 = vmatmul.mubr.msk.f32.gmra.mrb[10].mxu0 %vm288_vm1, %v283_v20 }
 0x17c   : > { %v284_v21 = vpop.trf.xlu0 }
 0x17d   : > { %3152 = vmatprep.mubr.msk.f32.mxu0 %vm288_vm1, %v284_v21 }
 0x180   : > { %v285_v22 = vpop.trf.xlu0 }
 0x181   : > { %3153 = vmatmul.mubr.msk.f32.gmra.mrb[12].mxu0 %vm288_vm1, %v285_v22 }
 0x184   : > { %v286_v23 = vpop.trf.xlu0 }
 0x185   : > { %3155 = vmatprep.mubr.msk.f32.mxu0 %vm288_vm1, %v286_v23 }
 0x188   : > { %v287_v24 = vpop.trf.xlu0 }
 0x189   : > { %3156 = vmatmul.mubr.msk.f32.gmra.mrb[14].mxu0 %vm288_vm1, %v287_v24 }
 0x224   : > { %v3136_v33 = vpop.f32.mrb[0].mxu0 }
 0x225   : > { %v409_v34 = vadd.f32 %v3136_v33, %v241_v31  ;;  %v403_v36 = vpop.f32.mrb[1].mxu0 }
 0x226   : > { %v404_v38 = vadd.f32 %v403_v36, %v240_v32 }
 0x227   : > { %v483_v41 = vmul.f32 %v409_v34, %v409_v34  ;;  %v545_v42 = vmul.f32 0.5, %v409_v34 }
 0x228   : > { %v482_v44 = vmul.f32 %v404_v38, %v404_v38  ;;  %v544_v45 = vmul.f32 0.5, %v404_v38  ;;  %v4587_v46 = vpack.c.bf16 %v409_v34, %v404_v38 }
 0x229   : > { %v4589_v47 = vsub.f32 %v529_v35, %v545_v42 }
 0x22a   : > { %v498_v49 = vadd.f32 %v483_v41, %v482_v44  ;;  %v4592_v50 = vsub.f32 %v528_v39, %v544_v45 }
 0x22c   : > { %v3139_v52 = vpop.f32.mrb[2].mxu0  ;;  %3190 = vmatprep.mubr.f32.mxu1 %v4592_v50  ;;  %v3865_v53 = vpack.c.bf16 %v4589_v47, %v4592_v50 }
 0x22d   : > { %v419_v54 = vadd.f32 %v3139_v52, %v243_v48  ;;  %v413_v56 = vpop.f32.mrb[3].mxu0 }
 0x22e   : > { %v414_v57 = vadd.f32 %v413_v56, %v242_v51  ;;  %3866 = vmatprep.subr.bf16.mxu1 %v3865_v53  ;;  %3898 = vmatprep.subr.bf16.mxu0 %v3865_v53 }
 0x22f   : > { %v547_v59 = vmul.f32 0.5, %v419_v54  ;;  %3868 = vmatpush3.bf16.msra.mxu1 %v3865_v53  ;;  %3900 = vmatpush3.bf16.msra.mxu0 %v3865_v53  ;;  %v485_v1 = vmul.f32 %v419_v54, %v419_v54 }
 0x230   : > { %v484_v61 = vmul.f32 %v414_v57, %v414_v57  ;;  %v546_v62 = vmul.f32 0.5, %v414_v57  ;;  %v4598_v63 = vpack.c.bf16 %v419_v54, %v414_v57 }
 0x231   : > { %v4600_v0 = vsub.f32 %v531_v55, %v547_v59 }
 0x232   : > { %v499_v2 = vadd.f32 %v498_v49, %v484_v61  ;;  %v4602_v3 = vsub.f32 %v530_v58, %v546_v62 }
 0x234   : > { %v3142_v6 = vpop.f32.mrb[4].mxu0  ;;  %v500_v7 = vadd.f32 %v499_v2, %v485_v1  ;;  %v3869_v9 = vpack.c.bf16 %v4600_v0, %v4602_v3 }
 0x235   : > { %v423_v10 = vpop.f32.mrb[5].mxu0  ;;  %v549_v11 = vmul.f32 0.5, %v3142_v6  ;;  %v487_v17 = vmul.f32 %v3142_v6, %v3142_v6 }
 0x236   : > { %v424_v12 = vadd.f32 %v423_v10, %v244_v4  ;;  %3870 = vmatprep.subr.bf16.mxu1 %v3869_v9  ;;  %3902 = vmatprep.subr.bf16.mxu0 %v3869_v9 }
 0x237   : > { %3872 = vmatpush3.bf16.msra.mxu1 %v3869_v9  ;;  %3904 = vmatpush3.bf16.msra.mxu0 %v3869_v9  ;;  %v4608_v18 = vsub.f32 0.0, %v549_v11 }
 0x238   : > { %v486_v14 = vmul.f32 %v424_v12, %v424_v12  ;;  %v548_v15 = vmul.f32 0.5, %v424_v12  ;;  %v4606_v16 = vpack.c.bf16 %v3142_v6, %v424_v12 }
 0x23a   : > { %v501_v19 = vadd.f32 %v500_v7, %v486_v14  ;;  %v4610_v20 = vsub.f32 %v532_v13, %v548_v15 }
 0x23c   : > { %v3145_v21 = vpop.f32.mrb[6].mxu0  ;;  %v502_v22 = vadd.f32 %v501_v19, %v487_v17  ;;  %v3873_v23 = vpack.c.bf16 %v4608_v18, %v4610_v20 }
 0x23d   : > { %v551_v24 = vmul.f32 0.5, %v3145_v21  ;;  %v433_v25 = vpop.f32.mrb[7].mxu0  ;;  %v489_v30 = vmul.f32 %v3145_v21, %v3145_v21 }
 0x23e   : > { %v488_v26 = vmul.f32 %v433_v25, %v433_v25  ;;  %v550_v27 = vmul.f32 0.5, %v433_v25  ;;  %v4614_v28 = vpack.c.bf16 %v3145_v21, %v433_v25  ;;  %3874 = vmatprep.subr.bf16.mxu1 %v3873_v23  ;;  %3906 = vmatprep.subr.bf16.mxu0 %v3873_v23 }
 0x23f   : > { %v4616_v29 = vsub.f32 0.0, %v551_v24  ;;  %3876 = vmatpush3.bf16.msra.mxu1 %v3873_v23  ;;  %3908 = vmatpush3.bf16.msra.mxu0 %v3873_v23 }
 0x240   : > { %v503_v31 = vadd.f32 %v502_v22, %v488_v26  ;;  %v4618_v32 = vsub.f32 0.0, %v550_v27 }
 0x242   : > { %v3877_v33 = vpack.c.bf16 %v4616_v29, %v4618_v32  ;;  %v504_v34 = vadd.f32 %v503_v31, %v489_v30 }
 0x244   : > { %v3148_v35 = vpop.f32.mrb[8].mxu0  ;;  %3878 = vmatprep.subr.bf16.mxu1 %v3877_v33  ;;  %3910 = vmatprep.subr.bf16.mxu0 %v3877_v33 }
 0x245   : > { %v553_v36 = vmul.f32 0.5, %v3148_v35  ;;  %v443_v37 = vpop.f32.mrb[9].mxu0  ;;  %3880 = vmatpush3.bf16.msra.mxu1 %v3877_v33  ;;  %3912 = vmatpush3.bf16.msra.mxu0 %v3877_v33  ;;  %v491_v42 = vmul.f32 %v3148_v35, %v3148_v35 }
 0x246   : > { %v490_v38 = vmul.f32 %v443_v37, %v443_v37  ;;  %v552_v39 = vmul.f32 0.5, %v443_v37  ;;  %v4622_v40 = vpack.c.bf16 %v3148_v35, %v443_v37 }
 0x247   : > { %v4624_v41 = vsub.f32 0.0, %v553_v36 }
 0x248   : > { %v505_v43 = vadd.f32 %v504_v34, %v490_v38  ;;  %v4626_v44 = vsub.f32 0.0, %v552_v39 }
 0x24a   : > { %v3881_v45 = vpack.c.bf16 %v4624_v41, %v4626_v44  ;;  %v506_v48 = vadd.f32 %v505_v43, %v491_v42 }
 0x24c   : > { %v3151_v49 = vpop.f32.mrb[10].mxu0  ;;  %3882 = vmatprep.subr.bf16.mxu1 %v3881_v45  ;;  %3914 = vmatprep.subr.bf16.mxu0 %v3881_v45 }
 0x24d   : > { %v555_v51 = vmul.f32 0.5, %v3151_v49  ;;  %v453_v52 = vpop.f32.mrb[11].mxu0  ;;  %3884 = vmatpush3.bf16.msra.mxu1 %v3881_v45  ;;  %3916 = vmatpush3.bf16.msra.mxu0 %v3881_v45  ;;  %v493_v57 = vmul.f32 %v3151_v49, %v3151_v49 }
 0x24e   : > { %v492_v53 = vmul.f32 %v453_v52, %v453_v52  ;;  %v554_v54 = vmul.f32 0.5, %v453_v52  ;;  %v4630_v55 = vpack.c.bf16 %v3151_v49, %v453_v52 }
 0x24f   : > { %v4632_v56 = vsub.f32 0.0, %v555_v51 }
 0x250   : > { %v507_v58 = vadd.f32 %v506_v48, %v492_v53  ;;  %v4634_v59 = vsub.f32 0.0, %v554_v54 }
 0x252   : > { %v3885_v60 = vpack.c.bf16 %v4632_v56, %v4634_v59  ;;  %v508_v61 = vadd.f32 %v507_v58, %v493_v57 }
 0x254   : > { %v3154_v62 = vpop.f32.mrb[12].mxu0  ;;  %3886 = vmatprep.subr.bf16.mxu1 %v3885_v60  ;;  %3918 = vmatprep.subr.bf16.mxu0 %v3885_v60 }
 0x255   : > { %v557_v1 = vmul.f32 0.5, %v3154_v62  ;;  %v463_v2 = vpop.f32.mrb[13].mxu0  ;;  %3888 = vmatpush3.bf16.msra.mxu1 %v3885_v60  ;;  %3920 = vmatpush3.bf16.msra.mxu0 %v3885_v60  ;;  %v495_v10 = vmul.f32 %v3154_v62, %v3154_v62 }
 0x256   : > { %v494_v4 = vmul.f32 %v463_v2, %v463_v2  ;;  %v556_v6 = vmul.f32 0.5, %v463_v2  ;;  %v4638_v7 = vpack.c.bf16 %v3154_v62, %v463_v2 }
 0x257   : > { %v4640_v9 = vsub.f32 0.0, %v557_v1 }
 0x258   : > { %v509_v11 = vadd.f32 %v508_v61, %v494_v4  ;;  %v4642_v12 = vsub.f32 0.0, %v556_v6 }
 0x25a   : > { %v3889_v13 = vpack.c.bf16 %v4640_v9, %v4642_v12  ;;  %v510_v14 = vadd.f32 %v509_v11, %v495_v10 }
 0x25c   : > { %v3157_v15 = vpop.f32.mrb[14].mxu0  ;;  %3890 = vmatprep.subr.bf16.mxu1 %v3889_v13  ;;  %3922 = vmatprep.subr.bf16.mxu0 %v3889_v13 }
 0x25d   : > { %v559_v17 = vmul.f32 0.5, %v3157_v15  ;;  %v473_v19 = vpop.f32.mrb[15].mxu0  ;;  %3892 = vmatpush3.bf16.msra.mxu1 %v3889_v13  ;;  %3924 = vmatpush3.bf16.msra.mxu0 %v3889_v13  ;;  %v497_v26 = vmul.f32 %v3157_v15, %v3157_v15 }
 0x25e   : > { %v496_v21 = vmul.f32 %v473_v19, %v473_v19  ;;  %v558_v22 = vmul.f32 0.5, %v473_v19  ;;  %v4646_v23 = vpack.c.bf16 %v3157_v15, %v473_v19 }
 0x25f   : > { %v4648_v24 = vsub.f32 0.0, %v559_v17 }
 0x260   : > { %v4650_v25 = vsub.f32 0.0, %v558_v22  ;;  %v511_v27 = vadd.f32 %v510_v14, %v496_v21  ;;  %v867_v22 = vmul.f32 1.5, %v4589_v47 }
 0x262   : > { %v3893_v30 = vpack.c.bf16 %v4648_v24, %v4650_v25  ;;  %v512_v31 = vadd.f32 %v511_v27, %v497_v26 }
 0x264   : > { %3894 = vmatprep.subr.bf16.mxu1 %v3893_v30  ;;  %3926 = vmatprep.subr.bf16.mxu0 %v3893_v30 }
 0x265   : > { %513 = vadd.xlane.f32.xlu1 %v512_v31  ;;  %3896 = vmatpush3.bf16.msra.mxu1 %v3893_v30 }
 0x266   : > { %3928 = vmatpush3.bf16.msra.mxu0 %v3893_v30  ;;  %3930 = vmatprep.subr.bf16.mxu1 %v4587_v46  ;;  %v866_v30 = vmul.f32 1.5, %v4592_v50 }
 0x268   : > { %3191 = vmatmul.mubr.f32.vlgmr.msra.gmra.mrb[0].mxu1 %v4589_v47 }
 0x269   : > { %3193 = vmatprep.mubr.f32.mxu1 %v4602_v3  ;;  %3932 = vmatpush3.bf16.msra.mxu1 %v4587_v46 }
 0x26a   : > { %3934 = vmatprep.subr.bf16.mxu1 %v4598_v63 }
 0x26c   : > { %3194 = vmatmul.mubr.f32.gmra.mrb[2].mxu1 %v4600_v0 }
 0x26d   : > { %3196 = vmatprep.mubr.f32.mxu1 %v4610_v20  ;;  %3936 = vmatpush3.bf16.msra.mxu1 %v4598_v63 }
 0x26e   : > { %3938 = vmatprep.subr.bf16.mxu1 %v4606_v16 }
 0x270   : > { %3197 = vmatmul.mubr.f32.gmra.mrb[4].mxu1 %v4608_v18 }
 0x271   : > { %3199 = vmatprep.mubr.f32.mxu1 %v4618_v32  ;;  %3940 = vmatpush3.bf16.msra.mxu1 %v4606_v16 }
 0x272   : > { %3942 = vmatprep.subr.bf16.mxu1 %v4614_v28 }
 0x274   : > { %3200 = vmatmul.mubr.f32.gmra.mrb[6].mxu1 %v4616_v29 }
 0x275   : > { %3202 = vmatprep.mubr.f32.mxu1 %v4626_v44  ;;  %3944 = vmatpush3.bf16.msra.mxu1 %v4614_v28 }
 0x276   : > { %3946 = vmatprep.subr.bf16.mxu1 %v4622_v40 }
 0x278   : > { %3203 = vmatmul.mubr.f32.gmra.mrb[8].mxu1 %v4624_v41 }
 0x279   : > { %3205 = vmatprep.mubr.f32.mxu1 %v4634_v59  ;;  %3948 = vmatpush3.bf16.msra.mxu1 %v4622_v40 }
 0x27a   : > { %3950 = vmatprep.subr.bf16.mxu1 %v4630_v55 }
 0x27c   : > { %3206 = vmatmul.mubr.f32.gmra.mrb[10].mxu1 %v4632_v56 }
 0x27d   : > { %3208 = vmatprep.mubr.f32.mxu1 %v4642_v12  ;;  %3952 = vmatpush3.bf16.msra.mxu1 %v4630_v55 }
 0x27e   : > { %3954 = vmatprep.subr.bf16.mxu1 %v4638_v7 }
 0x280   : > { %3209 = vmatmul.mubr.f32.gmra.mrb[12].mxu1 %v4640_v9 }
 0x281   : > { %3211 = vmatprep.mubr.f32.mxu1 %v4650_v25  ;;  %3956 = vmatpush3.bf16.msra.mxu1 %v4638_v7 }
 0x282   : > { %3958 = vmatprep.subr.bf16.mxu1 %v4646_v23 }
 0x284   : > { %3212 = vmatmul.mubr.f32.gmra.mrb[14].mxu1 %v4648_v24 }
 0x285   : > { %3960 = vmatpush3.bf16.msra.mxu1 %v4646_v23 }
 0x33b   : > { %v3192_v33 = vpop.f32.mrb[0].mxu1 }
 0x33c   : > { %v642_v34 = vpop.f32.mrb[1].mxu1 }
 0x33d   : > { %3246 = vmatprep.mubr.f32.mxu0 %v642_v34 }
 0x33e   : > { %3247 = vmatmul.mubr.f32.vlgmr.msra.gmra.mrb[16].mxu0 %v3192_v33 }
 0x33f   : > { %v3195_v35 = vpop.f32.mrb[2].mxu1 }
 0x340   : > { %v652_v36 = vpop.f32.mrb[3].mxu1 }
 0x341   : > { %3249 = vmatprep.mubr.f32.mxu0 %v652_v36  ;;  %v869_v36 = vmul.f32 1.5, %v4600_v0 }
 0x342   : > { %3250 = vmatmul.mubr.f32.gmra.mrb[18].mxu0 %v3195_v35 }
 0x343   : > { %v3198_v37 = vpop.f32.mrb[4].mxu1 }
 0x344   : > { %v662_v38 = vpop.f32.mrb[5].mxu1 }
 0x345   : > { %3252 = vmatprep.mubr.f32.mxu0 %v662_v38 }
 0x346   : > { %3253 = vmatmul.mubr.f32.gmra.mrb[20].mxu0 %v3198_v37 }
 0x347   : > { %v3201_v39 = vpop.f32.mrb[6].mxu1 }
 0x348   : > { %v672_v42 = vpop.f32.mrb[7].mxu1 }
 0x349   : > { %3255 = vmatprep.mubr.f32.mxu0 %v672_v42  ;;  %v868_v42 = vmul.f32 1.5, %v4602_v3  ;;  %v870_v3 = vmul.f32 1.5, %v4610_v20 }
 0x34a   : > { %3256 = vmatmul.mubr.f32.gmra.mrb[22].mxu0 %v3201_v39 }
 0x34b   : > { %v3204_v43 = vpop.f32.mrb[8].mxu1 }
 0x34c   : > { %v682_v45 = vpop.f32.mrb[9].mxu1 }
 0x34d   : > { %3258 = vmatprep.mubr.f32.mxu0 %v682_v45 }
 0x34e   : > { %3259 = vmatmul.mubr.f32.gmra.mrb[24].mxu0 %v3204_v43 }
 0x34f   : > { %v3207_v48 = vpop.f32.mrb[10].mxu1 }
 0x350   : > { %v692_v49 = vpop.f32.mrb[11].mxu1 }
 0x351   : > { %3261 = vmatprep.mubr.f32.mxu0 %v692_v49 }
 0x352   : > { %3262 = vmatmul.mubr.f32.gmra.mrb[26].mxu0 %v3207_v48  ;;  %v871_v48 = vmul.f32 1.5, %v4608_v18 }
 0x353   : > { %v3210_v51 = vpop.f32.mrb[12].mxu1 }
 0x354   : > { %v702_v52 = vpop.f32.mrb[13].mxu1 }
 0x355   : > { %3264 = vmatprep.mubr.f32.mxu0 %v702_v52 }
 0x356   : > { %3265 = vmatmul.mubr.f32.gmra.mrb[28].mxu0 %v3210_v51 }
 0x357   : > { %v3213_v53 = vpop.f32.mrb[14].mxu1 }
 0x358   : > { %v712_v54 = vpop.f32.mrb[15].mxu1 }
 0x359   : > { %3267 = vmatprep.mubr.f32.mxu0 %v712_v54 }
 0x35a   : > { %3268 = vmatmul.mubr.f32.gmra.mrb[30].mxu0 %v3213_v53 }
 0x411   : > { %v3248_v57 = vpop.f32.mrb[16].mxu0 }
 0x412   : > { %v787_v58 = vpop.f32.mrb[17].mxu0 }
 0x413   : > { %3302 = vmatprep.mubr.f32.mxu1 %v787_v58  ;;  %v873_v58 = vmul.f32 1.5, %v4616_v29 }
 0x414   : > { %3303 = vmatmul.mubr.f32.vlgmr.msra.gmra.mrb[16].mxu1 %v3248_v57 }
 0x415   : > { %v3251_v60 = vpop.f32.mrb[18].mxu0 }
 0x416   : > { %v797_v61 = vpop.f32.mrb[19].mxu0 }
 0x417   : > { %3305 = vmatprep.mubr.f32.mxu1 %v797_v61 }
 0x418   : > { %3306 = vmatmul.mubr.f32.gmra.mrb[18].mxu1 %v3251_v60 }
 0x419   : > { %v3254_v62 = vpop.f32.mrb[20].mxu0 }
 0x41a   : > { %v807_v1 = vpop.f32.mrb[21].mxu0 }
 0x41b   : > { %3308 = vmatprep.mubr.f32.mxu1 %v807_v1 }
 0x41c   : > { %3309 = vmatmul.mubr.f32.gmra.mrb[20].mxu1 %v3254_v62  ;;  %v872_v62 = vmul.f32 1.5, %v4618_v32 }
 0x41d   : > { %v3257_v2 = vpop.f32.mrb[22].mxu0 }
 0x41e   : > { %v817_v4 = vpop.f32.mrb[23].mxu0 }
 0x41f   : > { %3311 = vmatprep.mubr.f32.mxu1 %v817_v4 }
 0x420   : > { %3312 = vmatmul.mubr.f32.gmra.mrb[22].mxu1 %v3257_v2 }
 0x421   : > { %v3260_v6 = vpop.f32.mrb[24].mxu0 }
 0x422   : > { %v827_v10 = vpop.f32.mrb[25].mxu0 }
 0x423   : > { %3314 = vmatprep.mubr.f32.mxu1 %v827_v10 }
 0x424   : > { %3315 = vmatmul.mubr.f32.gmra.mrb[24].mxu1 %v3260_v6  ;;  %v875_v6 = vmul.f32 1.5, %v4624_v41 }
 0x425   : > { %v3263_v11 = vpop.f32.mrb[26].mxu0 }
 0x426   : > { %v837_v13 = vpop.f32.mrb[27].mxu0 }
 0x427   : > { %3317 = vmatprep.mubr.f32.mxu1 %v837_v13  ;;  %v874_v13 = vmul.f32 1.5, %v4626_v44 }
 0x428   : > { %3318 = vmatmul.mubr.f32.gmra.mrb[26].mxu1 %v3263_v11 }
 0x429   : > { %v3266_v14 = vpop.f32.mrb[28].mxu0 }
 0x42a   : > { %v847_v15 = vpop.f32.mrb[29].mxu0 }
 0x42b   : > { %3320 = vmatprep.mubr.f32.mxu1 %v847_v15 }
 0x42c   : > { %3321 = vmatmul.mubr.f32.gmra.mrb[28].mxu1 %v3266_v14 }
 0x42d   : > { %v3269_v17 = vpop.f32.mrb[30].mxu0 }
 0x42e   : > { %v857_v19 = vpop.f32.mrb[31].mxu0 }
 0x42f   : > { %3323 = vmatprep.mubr.f32.mxu1 %v857_v19  ;;  %v877_v19 = vmul.f32 1.5, %v4632_v56 }
 0x430   : > { %3324 = vmatmul.mubr.f32.gmra.mrb[30].mxu1 %v3269_v17 }
 0x4e7   : > { %v3304_v21 = vpop.f32.mrb[16].mxu1 }
 0x4e8   : > { %v1028_v26 = vmul.f32 0.5, %v3304_v21  ;;  %v948_v27 = vpop.f32.mrb[17].mxu1 }
 0x4e9   : > { %v1027_v31 = vmul.f32 0.5, %v948_v27 }
 0x4ea   : > { %v4687_v33 = vsub.f32 %v867_v22, %v1028_v26  ;;  %v876_v26 = vmul.f32 1.5, %v4634_v59 }
 0x4eb   : > { %v4689_v34 = vsub.f32 %v866_v30, %v1027_v31  ;;  %v3307_v35 = vpop.f32.mrb[18].mxu1 }
 0x4ec   : > { %v1030_v37 = vmul.f32 0.5, %v3307_v35  ;;  %v958_v38 = vpop.f32.mrb[19].mxu1  ;;  %v879_v35 = vmul.f32 1.5, %v4640_v9 }
 0x4ed   : > { %v3961_v39 = vpack.c.bf16 %v4687_v33, %v4689_v34  ;;  %v1029_v47 = vmul.f32 0.5, %v958_v38  ;;  %3358 = vmatprep.mubr.f32.mxu0 %v4689_v34  ;;  %v878_v38 = vmul.f32 1.5, %v4642_v12 }
 0x4ee   : > { %v4696_v43 = vsub.f32 %v869_v36, %v1030_v37 }
 0x4ef   : > { %v4698_v50 = vsub.f32 %v868_v42, %v1029_v47  ;;  %v3310_v45 = vpop.f32.mrb[20].mxu1  ;;  %3962 = vmatprep.subr.bf16.mxu0 %v3961_v39  ;;  %3994 = vmatprep.subr.bf16.mxu1 %v3961_v39 }
 0x4f0   : > { %v1032_v0 = vmul.f32 0.5, %v3310_v45  ;;  %v968_v49 = vpop.f32.mrb[21].mxu1  ;;  %3964 = vmatpush3.bf16.msra.mxu0 %v3961_v39  ;;  %3996 = vmatpush3.bf16.msra.mxu1 %v3961_v39  ;;  %v881_v45 = vmul.f32 1.5, %v4648_v24 }
 0x4f1   : > { %v3965_v51 = vpack.c.bf16 %v4696_v43, %v4698_v50  ;;  %v1031_v52 = vmul.f32 0.5, %v968_v49  ;;  %v880_v49 = vmul.f32 1.5, %v4650_v25 }
 0x4f2   : > { %v4704_v53 = vsub.f32 %v871_v48, %v1032_v0 }
 0x4f3   : > { %v4706_v54 = vsub.f32 %v870_v3, %v1031_v52  ;;  %v3313_v57 = vpop.f32.mrb[22].mxu1  ;;  %3966 = vmatprep.subr.bf16.mxu0 %v3965_v51  ;;  %3998 = vmatprep.subr.bf16.mxu1 %v3965_v51 }
 0x4f4   : > { %v1034_v18 = vmul.f32 0.5, %v3313_v57  ;;  %v978_v60 = vpop.f32.mrb[23].mxu1  ;;  %3968 = vmatpush3.bf16.msra.mxu0 %v3965_v51  ;;  %4000 = vmatpush3.bf16.msra.mxu1 %v3965_v51 }
 0x4f5   : > { %v3969_v61 = vpack.c.bf16 %v4704_v53, %v4706_v54  ;;  %v1033_v20 = vmul.f32 0.5, %v978_v60 }
 0x4f6   : > { %v4712_v1 = vsub.f32 %v873_v58, %v1034_v18 }
 0x4f7   : > { %v4714_v2 = vsub.f32 %v872_v62, %v1033_v20  ;;  %v3316_v4 = vpop.f32.mrb[24].mxu1  ;;  %3970 = vmatprep.subr.bf16.mxu0 %v3969_v61  ;;  %4002 = vmatprep.subr.bf16.mxu1 %v3969_v61 }
 0x4f8   : > { %v1036_v29 = vmul.f32 0.5, %v3316_v4  ;;  %v988_v10 = vpop.f32.mrb[25].mxu1  ;;  %3972 = vmatpush3.bf16.msra.mxu0 %v3969_v61  ;;  %4004 = vmatpush3.bf16.msra.mxu1 %v3969_v61 }
 0x4f9   : > { %v3973_v11 = vpack.c.bf16 %v4712_v1, %v4714_v2  ;;  %v1035_v32 = vmul.f32 0.5, %v988_v10 }
 0x4fa   : > { %v4720_v14 = vsub.f32 %v875_v6, %v1036_v29 }
 0x4fb   : > { %v4722_v15 = vsub.f32 %v874_v13, %v1035_v32  ;;  %v3319_v17 = vpop.f32.mrb[26].mxu1  ;;  %3974 = vmatprep.subr.bf16.mxu0 %v3973_v11  ;;  %4006 = vmatprep.subr.bf16.mxu1 %v3973_v11 }
 0x4fc   : > { %v1038_v41 = vmul.f32 0.5, %v3319_v17  ;;  %v998_v21 = vpop.f32.mrb[27].mxu1  ;;  %3976 = vmatpush3.bf16.msra.mxu0 %v3973_v11  ;;  %4008 = vmatpush3.bf16.msra.mxu1 %v3973_v11 }
 0x4fd   : > { %v3977_v22 = vpack.c.bf16 %v4720_v14, %v4722_v15  ;;  %v1037_v44 = vmul.f32 0.5, %v998_v21 }
 0x4fe   : > { %v4728_v27 = vsub.f32 %v877_v19, %v1038_v41 }
 0x4ff   : > { %v4730_v30 = vsub.f32 %v876_v26, %v1037_v44  ;;  %v3322_v31 = vpop.f32.mrb[28].mxu1  ;;  %3978 = vmatprep.subr.bf16.mxu0 %v3977_v22  ;;  %4010 = vmatprep.subr.bf16.mxu1 %v3977_v22 }
 0x500   : > { %v1040_v56 = vmul.f32 0.5, %v3322_v31  ;;  %v1008_v36 = vpop.f32.mrb[29].mxu1  ;;  %3980 = vmatpush3.bf16.msra.mxu0 %v3977_v22  ;;  %4012 = vmatpush3.bf16.msra.mxu1 %v3977_v22 }
 0x501   : > { %v3981_v37 = vpack.c.bf16 %v4728_v27, %v4730_v30  ;;  %v1039_v59 = vmul.f32 0.5, %v1008_v36 }
 0x502   : > { %v4736_v39 = vsub.f32 %v879_v35, %v1040_v56 }
 0x503   : > { %v4738_v42 = vsub.f32 %v878_v38, %v1039_v59  ;;  %v3325_v47 = vpop.f32.mrb[30].mxu1  ;;  %3982 = vmatprep.subr.bf16.mxu0 %v3981_v37  ;;  %4014 = vmatprep.subr.bf16.mxu1 %v3981_v37 }
 0x504   : > { %v1042_v9 = vmul.f32 0.5, %v3325_v47  ;;  %v1018_v48 = vpop.f32.mrb[31].mxu1  ;;  %3984 = vmatpush3.bf16.msra.mxu0 %v3981_v37  ;;  %4016 = vmatpush3.bf16.msra.mxu1 %v3981_v37 }
 0x505   : > { %v3985_v0 = vpack.c.bf16 %v4736_v39, %v4738_v42  ;;  %v1041_v12 = vmul.f32 0.5, %v1018_v48  ;;  %v1350_v48 = vmul.f32 1.5, %v4687_v33 }
 0x506   : > { %v4744_v51 = vsub.f32 %v881_v45, %v1042_v9 }
 0x507   : > { %v4746_v3 = vsub.f32 %v880_v49, %v1041_v12  ;;  %3986 = vmatprep.subr.bf16.mxu0 %v3985_v0  ;;  %4018 = vmatprep.subr.bf16.mxu1 %v3985_v0  ;;  %v1349_v12 = vmul.f32 1.5, %v4689_v34 }
 0x508   : > { %3988 = vmatpush3.bf16.msra.mxu0 %v3985_v0  ;;  %4020 = vmatpush3.bf16.msra.mxu1 %v3985_v0 }
 0x509   : > { %v3989_v24 = vpack.c.bf16 %v4744_v51, %v4746_v3 }
 0x50b   : > { %3990 = vmatprep.subr.bf16.mxu0 %v3989_v24  ;;  %4022 = vmatprep.subr.bf16.mxu1 %v3989_v24 }
 0x50c   : > { %3992 = vmatpush3.bf16.msra.mxu0 %v3989_v24  ;;  %4024 = vmatpush3.bf16.msra.mxu1 %v3989_v24 }
 0x50d   : > { %4026 = vmatprep.subr.bf16.mxu0 %v4587_v46 }
 0x50f   : > { %3359 = vmatmul.mubr.f32.vlgmr.msra.gmra.mrb[32].mxu0 %v4687_v33 }
 0x510   : > { %3361 = vmatprep.mubr.f32.mxu0 %v4698_v50  ;;  %4028 = vmatpush3.bf16.msra.mxu0 %v4587_v46 }
 0x511   : > { %4030 = vmatprep.subr.bf16.mxu0 %v4598_v63 }
 0x513   : > { %3362 = vmatmul.mubr.f32.gmra.mrb[34].mxu0 %v4696_v43 }
 0x514   : > { %3364 = vmatprep.mubr.f32.mxu0 %v4706_v54  ;;  %4032 = vmatpush3.bf16.msra.mxu0 %v4598_v63 }
 0x515   : > { %4034 = vmatprep.subr.bf16.mxu0 %v4606_v16 }
 0x517   : > { %3365 = vmatmul.mubr.f32.gmra.mrb[36].mxu0 %v4704_v53 }
 0x518   : > { %3367 = vmatprep.mubr.f32.mxu0 %v4714_v2  ;;  %4036 = vmatpush3.bf16.msra.mxu0 %v4606_v16 }
 0x519   : > { %4038 = vmatprep.subr.bf16.mxu0 %v4614_v28 }
 0x51b   : > { %3368 = vmatmul.mubr.f32.gmra.mrb[38].mxu0 %v4712_v1 }
 0x51c   : > { %3370 = vmatprep.mubr.f32.mxu0 %v4722_v15  ;;  %4040 = vmatpush3.bf16.msra.mxu0 %v4614_v28 }
 0x51d   : > { %4042 = vmatprep.subr.bf16.mxu0 %v4622_v40 }
 0x51f   : > { %3371 = vmatmul.mubr.f32.gmra.mrb[40].mxu0 %v4720_v14 }
 0x520   : > { %3373 = vmatprep.mubr.f32.mxu0 %v4730_v30  ;;  %4044 = vmatpush3.bf16.msra.mxu0 %v4622_v40 }
 0x521   : > { %4046 = vmatprep.subr.bf16.mxu0 %v4630_v55 }
 0x523   : > { %3374 = vmatmul.mubr.f32.gmra.mrb[42].mxu0 %v4728_v27 }
 0x524   : > { %3376 = vmatprep.mubr.f32.mxu0 %v4738_v42  ;;  %4048 = vmatpush3.bf16.msra.mxu0 %v4630_v55 }
 0x525   : > { %4050 = vmatprep.subr.bf16.mxu0 %v4638_v7 }
 0x527   : > { %3377 = vmatmul.mubr.f32.gmra.mrb[44].mxu0 %v4736_v39 }
 0x528   : > { %3379 = vmatprep.mubr.f32.mxu0 %v4746_v3  ;;  %4052 = vmatpush3.bf16.msra.mxu0 %v4638_v7 }
 0x529   : > { %4054 = vmatprep.subr.bf16.mxu0 %v4646_v23 }
 0x52b   : > { %3380 = vmatmul.mubr.f32.gmra.mrb[46].mxu0 %v4744_v51 }
 0x52c   : > { %4056 = vmatpush3.bf16.msra.mxu0 %v4646_v23 }
 0x5e2   : > { %v3360_v25 = vpop.f32.mrb[32].mxu0 }
 0x5e3   : > { %v1125_v52 = vpop.f32.mrb[33].mxu0 }
 0x5e4   : > { %3414 = vmatprep.mubr.f32.mxu1 %v1125_v52 }
 0x5e5   : > { %3415 = vmatmul.mubr.f32.vlgmr.msra.gmra.mrb[32].mxu1 %v3360_v25 }
 0x5e6   : > { %v3363_v57 = vpop.f32.mrb[34].mxu0 }
 0x5e7   : > { %v1135_v58 = vpop.f32.mrb[35].mxu0 }
 0x5e8   : > { %3417 = vmatprep.mubr.f32.mxu1 %v1135_v58  ;;  %v1352_v58 = vmul.f32 1.5, %v4696_v43 }
 0x5e9   : > { %3418 = vmatmul.mubr.f32.gmra.mrb[34].mxu1 %v3363_v57 }
 0x5ea   : > { %v3366_v18 = vpop.f32.mrb[36].mxu0 }
 0x5eb   : > { %v1145_v60 = vpop.f32.mrb[37].mxu0 }
 0x5ec   : > { %3420 = vmatprep.mubr.f32.mxu1 %v1145_v60 }
 0x5ed   : > { %3421 = vmatmul.mubr.f32.gmra.mrb[36].mxu1 %v3366_v18 }
 0x5ee   : > { %v3369_v61 = vpop.f32.mrb[38].mxu0 }
 0x5ef   : > { %v1155_v62 = vpop.f32.mrb[39].mxu0 }
 0x5f0   : > { %3423 = vmatprep.mubr.f32.mxu1 %v1155_v62  ;;  %v1351_v62 = vmul.f32 1.5, %v4698_v50  ;;  %v1353_v50 = vmul.f32 1.5, %v4706_v54 }
 0x5f1   : > { %3424 = vmatmul.mubr.f32.gmra.mrb[38].mxu1 %v3369_v61 }
 0x5f2   : > { %v3372_v20 = vpop.f32.mrb[40].mxu0 }
 0x5f3   : > { %v1165_v4 = vpop.f32.mrb[41].mxu0 }
 0x5f4   : > { %3426 = vmatprep.mubr.f32.mxu1 %v1165_v4 }
 0x5f5   : > { %3427 = vmatmul.mubr.f32.gmra.mrb[40].mxu1 %v3372_v20 }
 0x5f6   : > { %v3375_v6 = vpop.f32.mrb[42].mxu0 }
 0x5f7   : > { %v1175_v29 = vpop.f32.mrb[43].mxu0 }
 0x5f8   : > { %3429 = vmatprep.mubr.f32.mxu1 %v1175_v29 }
 0x5f9   : > { %3430 = vmatmul.mubr.f32.gmra.mrb[42].mxu1 %v3375_v6  ;;  %v1354_v6 = vmul.f32 1.5, %v4704_v53 }
 0x5fa   : > { %v3378_v10 = vpop.f32.mrb[44].mxu0 }
 0x5fb   : > { %v1185_v11 = vpop.f32.mrb[45].mxu0 }
 0x5fc   : > { %3432 = vmatprep.mubr.f32.mxu1 %v1185_v11 }
 0x5fd   : > { %3433 = vmatmul.mubr.f32.gmra.mrb[44].mxu1 %v3378_v10 }
 0x5fe   : > { %v3381_v13 = vpop.f32.mrb[46].mxu0 }
 0x5ff   : > { %v1195_v32 = vpop.f32.mrb[47].mxu0 }
 0x600   : > { %3435 = vmatprep.mubr.f32.mxu1 %v1195_v32 }
 0x601   : > { %3436 = vmatmul.mubr.f32.gmra.mrb[46].mxu1 %v3381_v13 }
 0x6b8   : > { %v3416_v17 = vpop.f32.mrb[32].mxu1 }
 0x6b9   : > { %v1270_v19 = vpop.f32.mrb[33].mxu1 }
 0x6ba   : > { %3470 = vmatprep.mubr.f32.mxu0 %v1270_v19  ;;  %v1356_v19 = vmul.f32 1.5, %v4712_v1 }
 0x6bb   : > { %3471 = vmatmul.mubr.f32.vlgmr.msra.gmra.mrb[48].mxu0 %v3416_v17 }
 0x6bc   : > { %v3419_v41 = vpop.f32.mrb[34].mxu1 }
 0x6bd   : > { %v1280_v21 = vpop.f32.mrb[35].mxu1 }
 0x6be   : > { %3473 = vmatprep.mubr.f32.mxu0 %v1280_v21 }
 0x6bf   : > { %3474 = vmatmul.mubr.f32.gmra.mrb[50].mxu0 %v3419_v41 }
 0x6c0   : > { %v3422_v22 = vpop.f32.mrb[36].mxu1 }
 0x6c1   : > { %v1290_v26 = vpop.f32.mrb[37].mxu1 }
 0x6c2   : > { %3476 = vmatprep.mubr.f32.mxu0 %v1290_v26 }
 0x6c3   : > { %3477 = vmatmul.mubr.f32.gmra.mrb[52].mxu0 %v3422_v22  ;;  %v1355_v22 = vmul.f32 1.5, %v4714_v2 }
 0x6c4   : > { %v3425_v44 = vpop.f32.mrb[38].mxu1 }
 0x6c5   : > { %v1300_v31 = vpop.f32.mrb[39].mxu1 }
 0x6c6   : > { %3479 = vmatprep.mubr.f32.mxu0 %v1300_v31 }
 0x6c7   : > { %3480 = vmatmul.mubr.f32.gmra.mrb[54].mxu0 %v3425_v44 }
 0x6c8   : > { %v3428_v35 = vpop.f32.mrb[40].mxu1 }
 0x6c9   : > { %v1310_v56 = vpop.f32.mrb[41].mxu1 }
 0x6ca   : > { %3482 = vmatprep.mubr.f32.mxu0 %v1310_v56 }
 0x6cb   : > { %3483 = vmatmul.mubr.f32.gmra.mrb[56].mxu0 %v3428_v35  ;;  %v1358_v35 = vmul.f32 1.5, %v4720_v14 }
 0x6cc   : > { %v3431_v36 = vpop.f32.mrb[42].mxu1 }
 0x6cd   : > { %v1320_v37 = vpop.f32.mrb[43].mxu1 }
 0x6ce   : > { %3485 = vmatprep.mubr.f32.mxu0 %v1320_v37  ;;  %v1357_v37 = vmul.f32 1.5, %v4722_v15 }
 0x6cf   : > { %3486 = vmatmul.mubr.f32.gmra.mrb[58].mxu0 %v3431_v36 }
 0x6d0   : > { %v3434_v38 = vpop.f32.mrb[44].mxu1 }
 0x6d1   : > { %v1330_v59 = vpop.f32.mrb[45].mxu1 }
 0x6d2   : > { %3488 = vmatprep.mubr.f32.mxu0 %v1330_v59 }
 0x6d3   : > { %3489 = vmatmul.mubr.f32.gmra.mrb[60].mxu0 %v3434_v38 }
 0x6d4   : > { %v3437_v47 = vpop.f32.mrb[46].mxu1 }
 0x6d5   : > { %v1340_v45 = vpop.f32.mrb[47].mxu1 }
 0x6d6   : > { %3491 = vmatprep.mubr.f32.mxu0 %v1340_v45  ;;  %v1360_v45 = vmul.f32 1.5, %v4728_v27 }
 0x6d7   : > { %3492 = vmatmul.mubr.f32.gmra.mrb[62].mxu0 %v3437_v47 }
 0x78e   : > { %v3472_v9 = vpop.f32.mrb[48].mxu0 }
 0x78f   : > { %v1511_v0 = vmul.f32 0.5, %v3472_v9  ;;  %v1431_v49 = vpop.f32.mrb[49].mxu0 }
 0x790   : > { %v1510_v24 = vmul.f32 0.5, %v1431_v49 }
 0x791   : > { %v4783_v25 = vsub.f32 %v1350_v48, %v1511_v0  ;;  %v1359_v0 = vmul.f32 1.5, %v4730_v30 }
 0x792   : > { %v4785_v52 = vsub.f32 %v1349_v12, %v1510_v24  ;;  %v3475_v57 = vpop.f32.mrb[50].mxu0 }
 0x793   : > { %v1513_v18 = vmul.f32 0.5, %v3475_v57  ;;  %v1441_v60 = vpop.f32.mrb[51].mxu0  ;;  %v1362_v57 = vmul.f32 1.5, %v4736_v39 }
 0x794   : > { %v4057_v61 = vpack.c.bf16 %v4783_v25, %v4785_v52  ;;  %v1512_v33 = vmul.f32 0.5, %v1441_v60  ;;  %3526 = vmatprep.mubr.f32.mxu1 %v4785_v52  ;;  %v1361_v60 = vmul.f32 1.5, %v4738_v42 }
 0x795   : > { %v4792_v20 = vsub.f32 %v1352_v58, %v1513_v18 }
 0x796   : > { %v4794_v34 = vsub.f32 %v1351_v62, %v1512_v33  ;;  %v3478_v4 = vpop.f32.mrb[52].mxu0  ;;  %4058 = vmatprep.subr.bf16.mxu1 %v4057_v61  ;;  %4090 = vmatprep.subr.bf16.mxu0 %v4057_v61 }
 0x797   : > { %v1515_v43 = vmul.f32 0.5, %v3478_v4  ;;  %v1451_v29 = vpop.f32.mrb[53].mxu0  ;;  %4060 = vmatpush3.bf16.msra.mxu1 %v4057_v61  ;;  %4092 = vmatpush3.bf16.msra.mxu0 %v4057_v61  ;;  %v1364_v4 = vmul.f32 1.5, %v4744_v51 }
 0x798   : > { %v4061_v10 = vpack.c.bf16 %v4792_v20, %v4794_v34  ;;  %v1514_v11 = vmul.f32 0.5, %v1451_v29  ;;  %v1363_v29 = vmul.f32 1.5, %v4746_v3 }
 0x799   : > { %v4800_v13 = vsub.f32 %v1354_v6, %v1515_v43 }
 0x79a   : > { %v4802_v32 = vsub.f32 %v1353_v50, %v1514_v11  ;;  %v3481_v17 = vpop.f32.mrb[54].mxu0  ;;  %4062 = vmatprep.subr.bf16.mxu1 %v4061_v10  ;;  %4094 = vmatprep.subr.bf16.mxu0 %v4061_v10 }
 0x79b   : > { %v1517_v53 = vmul.f32 0.5, %v3481_v17  ;;  %v1461_v41 = vpop.f32.mrb[55].mxu0  ;;  %4064 = vmatpush3.bf16.msra.mxu1 %v4061_v10  ;;  %4096 = vmatpush3.bf16.msra.mxu0 %v4061_v10 }
 0x79c   : > { %v4065_v21 = vpack.c.bf16 %v4800_v13, %v4802_v32  ;;  %v1516_v54 = vmul.f32 0.5, %v1461_v41 }
 0x79d   : > { %v4808_v26 = vsub.f32 %v1356_v19, %v1517_v53 }
 0x79e   : > { %v4810_v44 = vsub.f32 %v1355_v22, %v1516_v54  ;;  %v3484_v31 = vpop.f32.mrb[56].mxu0  ;;  %4066 = vmatprep.subr.bf16.mxu1 %v4065_v21  ;;  %4098 = vmatprep.subr.bf16.mxu0 %v4065_v21 }
 0x79f   : > { %v1519_v1 = vmul.f32 0.5, %v3484_v31  ;;  %v1471_v56 = vpop.f32.mrb[57].mxu0  ;;  %4068 = vmatpush3.bf16.msra.mxu1 %v4065_v21  ;;  %4100 = vmatpush3.bf16.msra.mxu0 %v4065_v21 }
 0x7a0   : > { %v4069_v36 = vpack.c.bf16 %v4808_v26, %v4810_v44  ;;  %v1518_v2 = vmul.f32 0.5, %v1471_v56 }
 0x7a1   : > { %v4816_v38 = vsub.f32 %v1358_v35, %v1519_v1 }
 0x7a2   : > { %v4818_v59 = vsub.f32 %v1357_v37, %v1518_v2  ;;  %v3487_v47 = vpop.f32.mrb[58].mxu0  ;;  %4070 = vmatprep.subr.bf16.mxu1 %v4069_v36  ;;  %4102 = vmatprep.subr.bf16.mxu0 %v4069_v36 }
 0x7a3   : > { %v1521_v14 = vmul.f32 0.5, %v3487_v47  ;;  %v1481_v9 = vpop.f32.mrb[59].mxu0  ;;  %4072 = vmatpush3.bf16.msra.mxu1 %v4069_v36  ;;  %4104 = vmatpush3.bf16.msra.mxu0 %v4069_v36 }
 0x7a4   : > { %v4073_v48 = vpack.c.bf16 %v4816_v38, %v4818_v59  ;;  %v1520_v15 = vmul.f32 0.5, %v1481_v9 }
 0x7a5   : > { %v4824_v49 = vsub.f32 %v1360_v45, %v1521_v14 }
 0x7a6   : > { %v4826_v12 = vsub.f32 %v1359_v0, %v1520_v15  ;;  %v3490_v24 = vpop.f32.mrb[60].mxu0  ;;  %4074 = vmatprep.subr.bf16.mxu1 %v4073_v48  ;;  %4106 = vmatprep.subr.bf16.mxu0 %v4073_v48 }
 0x7a7   : > { %v1523_v27 = vmul.f32 0.5, %v3490_v24  ;;  %v1491_v58 = vpop.f32.mrb[61].mxu0  ;;  %4076 = vmatpush3.bf16.msra.mxu1 %v4073_v48  ;;  %4108 = vmatpush3.bf16.msra.mxu0 %v4073_v48 }
 0x7a8   : > { %v4077_v18 = vpack.c.bf16 %v4824_v49, %v4826_v12  ;;  %v1522_v30 = vmul.f32 0.5, %v1491_v58 }
 0x7a9   : > { %v4832_v61 = vsub.f32 %v1362_v57, %v1523_v27 }
 0x7aa   : > { %v4834_v62 = vsub.f32 %v1361_v60, %v1522_v30  ;;  %v3493_v33 = vpop.f32.mrb[62].mxu0  ;;  %4078 = vmatprep.subr.bf16.mxu1 %v4077_v18  ;;  %4110 = vmatprep.subr.bf16.mxu0 %v4077_v18 }
 0x7ab   : > { %v1525_v39 = vmul.f32 0.5, %v3493_v33  ;;  %v1501_v6 = vpop.f32.mrb[63].mxu0  ;;  %4080 = vmatpush3.bf16.msra.mxu1 %v4077_v18  ;;  %4112 = vmatpush3.bf16.msra.mxu0 %v4077_v18 }
 0x7ac   : > { %v4081_v43 = vpack.c.bf16 %v4832_v61, %v4834_v62  ;;  %v1524_v42 = vmul.f32 0.5, %v1501_v6  ;;  %v1833_v6 = vmul.f32 1.5, %v4783_v25 }
 0x7ad   : > { %v4840_v10 = vsub.f32 %v1364_v4, %v1525_v39 }
 0x7ae   : > { %v4842_v50 = vsub.f32 %v1363_v29, %v1524_v42  ;;  %4082 = vmatprep.subr.bf16.mxu1 %v4081_v43  ;;  %4114 = vmatprep.subr.bf16.mxu0 %v4081_v43  ;;  %v1832_v42 = vmul.f32 1.5, %v4785_v52 }
 0x7af   : > { %4084 = vmatpush3.bf16.msra.mxu1 %v4081_v43  ;;  %4116 = vmatpush3.bf16.msra.mxu0 %v4081_v43 }
 0x7b0   : > { %v4085_v51 = vpack.c.bf16 %v4840_v10, %v4842_v50 }
 0x7b2   : > { %4086 = vmatprep.subr.bf16.mxu1 %v4085_v51  ;;  %4118 = vmatprep.subr.bf16.mxu0 %v4085_v51 }
 0x7b3   : > { %4088 = vmatpush3.bf16.msra.mxu1 %v4085_v51  ;;  %4120 = vmatpush3.bf16.msra.mxu0 %v4085_v51 }
 0x7b4   : > { %4122 = vmatprep.subr.bf16.mxu1 %v4587_v46 }
 0x7b6   : > { %3527 = vmatmul.mubr.f32.vlgmr.msra.gmra.mrb[48].mxu1 %v4783_v25 }
 0x7b7   : > { %3529 = vmatprep.mubr.f32.mxu1 %v4794_v34  ;;  %4124 = vmatpush3.bf16.msra.mxu1 %v4587_v46 }
 0x7b8   : > { %4126 = vmatprep.subr.bf16.mxu1 %v4598_v63 }
 0x7ba   : > { %3530 = vmatmul.mubr.f32.gmra.mrb[50].mxu1 %v4792_v20 }
 0x7bb   : > { %3532 = vmatprep.mubr.f32.mxu1 %v4802_v32  ;;  %4128 = vmatpush3.bf16.msra.mxu1 %v4598_v63 }
 0x7bc   : > { %4130 = vmatprep.subr.bf16.mxu1 %v4606_v16 }
 0x7be   : > { %3533 = vmatmul.mubr.f32.gmra.mrb[52].mxu1 %v4800_v13 }
 0x7bf   : > { %3535 = vmatprep.mubr.f32.mxu1 %v4810_v44  ;;  %4132 = vmatpush3.bf16.msra.mxu1 %v4606_v16 }
 0x7c0   : > { %4134 = vmatprep.subr.bf16.mxu1 %v4614_v28 }
 0x7c2   : > { %3536 = vmatmul.mubr.f32.gmra.mrb[54].mxu1 %v4808_v26 }
 0x7c3   : > { %3538 = vmatprep.mubr.f32.mxu1 %v4818_v59  ;;  %4136 = vmatpush3.bf16.msra.mxu1 %v4614_v28 }
 0x7c4   : > { %4138 = vmatprep.subr.bf16.mxu1 %v4622_v40 }
 0x7c6   : > { %3539 = vmatmul.mubr.f32.gmra.mrb[56].mxu1 %v4816_v38 }
 0x7c7   : > { %3541 = vmatprep.mubr.f32.mxu1 %v4826_v12  ;;  %4140 = vmatpush3.bf16.msra.mxu1 %v4622_v40 }
 0x7c8   : > { %4142 = vmatprep.subr.bf16.mxu1 %v4630_v55 }
 0x7ca   : > { %3542 = vmatmul.mubr.f32.gmra.mrb[58].mxu1 %v4824_v49 }
 0x7cb   : > { %3544 = vmatprep.mubr.f32.mxu1 %v4834_v62  ;;  %4144 = vmatpush3.bf16.msra.mxu1 %v4630_v55 }
 0x7cc   : > { %4146 = vmatprep.subr.bf16.mxu1 %v4638_v7 }
 0x7ce   : > { %3545 = vmatmul.mubr.f32.gmra.mrb[60].mxu1 %v4832_v61 }
 0x7cf   : > { %3547 = vmatprep.mubr.f32.mxu1 %v4842_v50  ;;  %4148 = vmatpush3.bf16.msra.mxu1 %v4638_v7 }
 0x7d0   : > { %4150 = vmatprep.subr.bf16.mxu1 %v4646_v23 }
 0x7d2   : > { %3548 = vmatmul.mubr.f32.gmra.mrb[62].mxu1 %v4840_v10 }
 0x7d3   : > { %4152 = vmatpush3.bf16.msra.mxu1 %v4646_v23 }
 0x889   : > { %v3528_v3 = vpop.f32.mrb[48].mxu1 }
 0x88a   : > { %v1608_v11 = vpop.f32.mrb[49].mxu1 }
 0x88b   : > { %3582 = vmatprep.mubr.f32.mxu0 %v1608_v11 }
 0x88c   : > { %3583 = vmatmul.mubr.f32.vlgmr.msra.gmra.mrb[64].mxu0 %v3528_v3 }
 0x88d   : > { %v3531_v17 = vpop.f32.mrb[50].mxu1 }
 0x88e   : > { %v1618_v19 = vpop.f32.mrb[51].mxu1 }
 0x88f   : > { %3585 = vmatprep.mubr.f32.mxu0 %v1618_v19  ;;  %v1835_v19 = vmul.f32 1.5, %v4792_v20 }
 0x890   : > { %3586 = vmatmul.mubr.f32.gmra.mrb[66].mxu0 %v3531_v17 }
 0x891   : > { %v3534_v53 = vpop.f32.mrb[52].mxu1 }
 0x892   : > { %v1628_v41 = vpop.f32.mrb[53].mxu1 }
 0x893   : > { %3588 = vmatprep.mubr.f32.mxu0 %v1628_v41 }
 0x894   : > { %3589 = vmatmul.mubr.f32.gmra.mrb[68].mxu0 %v3534_v53 }
 0x895   : > { %v3537_v21 = vpop.f32.mrb[54].mxu1 }
 0x896   : > { %v1638_v22 = vpop.f32.mrb[55].mxu1 }
 0x897   : > { %3591 = vmatprep.mubr.f32.mxu0 %v1638_v22  ;;  %v1834_v22 = vmul.f32 1.5, %v4794_v34  ;;  %v1836_v34 = vmul.f32 1.5, %v4802_v32 }
 0x898   : > { %3592 = vmatmul.mubr.f32.gmra.mrb[70].mxu0 %v3537_v21 }
 0x899   : > { %v3540_v54 = vpop.f32.mrb[56].mxu1 }
 0x89a   : > { %v1648_v31 = vpop.f32.mrb[57].mxu1 }
 0x89b   : > { %3594 = vmatprep.mubr.f32.mxu0 %v1648_v31 }
 0x89c   : > { %3595 = vmatmul.mubr.f32.gmra.mrb[72].mxu0 %v3540_v54 }
 0x89d   : > { %v3543_v35 = vpop.f32.mrb[58].mxu1 }
 0x89e   : > { %v1658_v1 = vpop.f32.mrb[59].mxu1 }
 0x89f   : > { %3597 = vmatprep.mubr.f32.mxu0 %v1658_v1 }
 0x8a0   : > { %3598 = vmatmul.mubr.f32.gmra.mrb[74].mxu0 %v3543_v35  ;;  %v1837_v35 = vmul.f32 1.5, %v4800_v13 }
 0x8a1   : > { %v3546_v56 = vpop.f32.mrb[60].mxu1 }
 0x8a2   : > { %v1668_v36 = vpop.f32.mrb[61].mxu1 }
 0x8a3   : > { %3600 = vmatprep.mubr.f32.mxu0 %v1668_v36 }
 0x8a4   : > { %3601 = vmatmul.mubr.f32.gmra.mrb[76].mxu0 %v3546_v56 }
 0x8a5   : > { %v3549_v37 = vpop.f32.mrb[62].mxu1 }
 0x8a6   : > { %v1678_v2 = vpop.f32.mrb[63].mxu1 }
 0x8a7   : > { %3603 = vmatprep.mubr.f32.mxu0 %v1678_v2 }
 0x8a8   : > { %3604 = vmatmul.mubr.f32.gmra.mrb[78].mxu0 %v3549_v37 }
 0x95f   : > { %v3584_v47 = vpop.f32.mrb[64].mxu0 }
 0x960   : > { %v1753_v45 = vpop.f32.mrb[65].mxu0 }
 0x961   : > { %3638 = vmatprep.mubr.f32.mxu1 %v1753_v45  ;;  %v1839_v45 = vmul.f32 1.5, %v4808_v26 }
 0x962   : > { %3639 = vmatmul.mubr.f32.vlgmr.msra.gmra.mrb[64].mxu1 %v3584_v47 }
 0x963   : > { %v3587_v14 = vpop.f32.mrb[66].mxu0 }
 0x964   : > { %v1763_v9 = vpop.f32.mrb[67].mxu0 }
 0x965   : > { %3641 = vmatprep.mubr.f32.mxu1 %v1763_v9 }
 0x966   : > { %3642 = vmatmul.mubr.f32.gmra.mrb[66].mxu1 %v3587_v14 }
 0x967   : > { %v3590_v48 = vpop.f32.mrb[68].mxu0 }
 0x968   : > { %v1773_v0 = vpop.f32.mrb[69].mxu0 }
 0x969   : > { %3644 = vmatprep.mubr.f32.mxu1 %v1773_v0 }
 0x96a   : > { %3645 = vmatmul.mubr.f32.gmra.mrb[68].mxu1 %v3590_v48  ;;  %v1838_v48 = vmul.f32 1.5, %v4810_v44 }
 0x96b   : > { %v3593_v15 = vpop.f32.mrb[70].mxu0 }
 0x96c   : > { %v1783_v24 = vpop.f32.mrb[71].mxu0 }
 0x96d   : > { %3647 = vmatprep.mubr.f32.mxu1 %v1783_v24 }
 0x96e   : > { %3648 = vmatmul.mubr.f32.gmra.mrb[70].mxu1 %v3593_v15 }
 0x96f   : > { %v3596_v57 = vpop.f32.mrb[72].mxu0 }
 0x970   : > { %v1793_v27 = vpop.f32.mrb[73].mxu0 }
 0x971   : > { %3650 = vmatprep.mubr.f32.mxu1 %v1793_v27 }
 0x972   : > { %3651 = vmatmul.mubr.f32.gmra.mrb[72].mxu1 %v3596_v57  ;;  %v1841_v57 = vmul.f32 1.5, %v4816_v38 }
 0x973   : > { %v3599_v58 = vpop.f32.mrb[74].mxu0 }
 0x974   : > { %v1803_v18 = vpop.f32.mrb[75].mxu0 }
 0x975   : > { %3653 = vmatprep.mubr.f32.mxu1 %v1803_v18  ;;  %v1840_v18 = vmul.f32 1.5, %v4818_v59 }
 0x976   : > { %3654 = vmatmul.mubr.f32.gmra.mrb[74].mxu1 %v3599_v58 }
 0x977   : > { %v3602_v60 = vpop.f32.mrb[76].mxu0 }
 0x978   : > { %v1813_v30 = vpop.f32.mrb[77].mxu0 }
 0x979   : > { %3656 = vmatprep.mubr.f32.mxu1 %v1813_v30 }
 0x97a   : > { %3657 = vmatmul.mubr.f32.gmra.mrb[76].mxu1 %v3602_v60 }
 0x97b   : > { %v3605_v33 = vpop.f32.mrb[78].mxu0 }
 0x97c   : > { %v1823_v4 = vpop.f32.mrb[79].mxu0 }
 0x97d   : > { %3659 = vmatprep.mubr.f32.mxu1 %v1823_v4  ;;  %v1843_v4 = vmul.f32 1.5, %v4824_v49 }
 0x97e   : > { %3660 = vmatmul.mubr.f32.gmra.mrb[78].mxu1 %v3605_v33 }
 0xa35   : > { %v3640_v39 = vpop.f32.mrb[64].mxu1 }
 0xa36   : > { %v1994_v43 = vmul.f32 0.5, %v3640_v39  ;;  %v1914_v29 = vpop.f32.mrb[65].mxu1 }
 0xa37   : > { %v1993_v51 = vmul.f32 0.5, %v1914_v29 }
 0xa38   : > { %v4879_v3 = vsub.f32 %v1833_v6, %v1994_v43  ;;  %v1842_v43 = vmul.f32 1.5, %v4826_v12 }
 0xa39   : > { %v4881_v11 = vsub.f32 %v1832_v42, %v1993_v51  ;;  %v3643_v17 = vpop.f32.mrb[66].mxu1 }
 0xa3a   : > { %v1996_v53 = vmul.f32 0.5, %v3643_v17  ;;  %v1924_v41 = vpop.f32.mrb[67].mxu1  ;;  %v1845_v17 = vmul.f32 1.5, %v4832_v61 }
 0xa3b   : > { %v4153_v21 = vpack.c.bf16 %v4879_v3, %v4881_v11  ;;  %v1995_v25 = vmul.f32 0.5, %v1924_v41  ;;  %3694 = vmatprep.mubr.f32.mxu0 %v4881_v11  ;;  %v1844_v41 = vmul.f32 1.5, %v4834_v62 }
 0xa3c   : > { %v4888_v54 = vsub.f32 %v1835_v19, %v1996_v53 }
 0xa3d   : > { %v4890_v52 = vsub.f32 %v1834_v22, %v1995_v25  ;;  %v3646_v31 = vpop.f32.mrb[68].mxu1  ;;  %4154 = vmatprep.subr.bf16.mxu0 %v4153_v21  ;;  %4186 = vmatprep.subr.bf16.mxu1 %v4153_v21 }
 0xa3e   : > { %v1998_v20 = vmul.f32 0.5, %v3646_v31  ;;  %v1934_v1 = vpop.f32.mrb[69].mxu1  ;;  %4156 = vmatpush3.bf16.msra.mxu0 %v4153_v21  ;;  %4188 = vmatpush3.bf16.msra.mxu1 %v4153_v21  ;;  %v1847_v31 = vmul.f32 1.5, %v4840_v10 }
 0xa3f   : > { %v4157_v56 = vpack.c.bf16 %v4888_v54, %v4890_v52  ;;  %v1997_v36 = vmul.f32 0.5, %v1934_v1  ;;  %v1846_v1 = vmul.f32 1.5, %v4842_v50 }
 0xa40   : > { %v4896_v37 = vsub.f32 %v1837_v35, %v1998_v20 }
 0xa41   : > { %v4898_v2 = vsub.f32 %v1836_v34, %v1997_v36  ;;  %v3649_v47 = vpop.f32.mrb[70].mxu1  ;;  %4158 = vmatprep.subr.bf16.mxu0 %v4157_v56  ;;  %4190 = vmatprep.subr.bf16.mxu1 %v4157_v56 }
 0xa42   : > { %v2000_v13 = vmul.f32 0.5, %v3649_v47  ;;  %v1944_v14 = vpop.f32.mrb[71].mxu1  ;;  %4160 = vmatpush3.bf16.msra.mxu0 %v4157_v56  ;;  %4192 = vmatpush3.bf16.msra.mxu1 %v4157_v56 }
 0xa43   : > { %v4161_v9 = vpack.c.bf16 %v4896_v37, %v4898_v2  ;;  %v1999_v32 = vmul.f32 0.5, %v1944_v14 }
 0xa44   : > { %v4904_v0 = vsub.f32 %v1839_v45, %v2000_v13 }
 0xa45   : > { %v4906_v15 = vsub.f32 %v1838_v48, %v1999_v32  ;;  %v3652_v24 = vpop.f32.mrb[72].mxu1  ;;  %4162 = vmatprep.subr.bf16.mxu0 %v4161_v9  ;;  %4194 = vmatprep.subr.bf16.mxu1 %v4161_v9 }
 0xa46   : > { %v2002_v26 = vmul.f32 0.5, %v3652_v24  ;;  %v1954_v27 = vpop.f32.mrb[73].mxu1  ;;  %4164 = vmatpush3.bf16.msra.mxu0 %v4161_v9  ;;  %4196 = vmatpush3.bf16.msra.mxu1 %v4161_v9 }
 0xa47   : > { %v4165_v58 = vpack.c.bf16 %v4904_v0, %v4906_v15  ;;  %v2001_v44 = vmul.f32 0.5, %v1954_v27 }
 0xa48   : > { %v4912_v60 = vsub.f32 %v1841_v57, %v2002_v26 }
 0xa49   : > { %v4914_v30 = vsub.f32 %v1840_v18, %v2001_v44  ;;  %v3655_v33 = vpop.f32.mrb[74].mxu1  ;;  %4166 = vmatprep.subr.bf16.mxu0 %v4165_v58  ;;  %4198 = vmatprep.subr.bf16.mxu1 %v4165_v58 }
 0xa4a   : > { %v2004_v38 = vmul.f32 0.5, %v3655_v33  ;;  %v1964_v39 = vpop.f32.mrb[75].mxu1  ;;  %4168 = vmatpush3.bf16.msra.mxu0 %v4165_v58  ;;  %4200 = vmatpush3.bf16.msra.mxu1 %v4165_v58 }
 0xa4b   : > { %v4169_v6 = vpack.c.bf16 %v4912_v60, %v4914_v30  ;;  %v2003_v59 = vmul.f32 0.5, %v1964_v39 }
 0xa4c   : > { %v4920_v29 = vsub.f32 %v1843_v4, %v2004_v38 }
 0xa4d   : > { %v4922_v42 = vsub.f32 %v1842_v43, %v2003_v59  ;;  %v3658_v51 = vpop.f32.mrb[76].mxu1  ;;  %4170 = vmatprep.subr.bf16.mxu0 %v4169_v6  ;;  %4202 = vmatprep.subr.bf16.mxu1 %v4169_v6 }
 0xa4e   : > { %v2006_v49 = vmul.f32 0.5, %v3658_v51  ;;  %v1974_v19 = vpop.f32.mrb[77].mxu1  ;;  %4172 = vmatpush3.bf16.msra.mxu0 %v4169_v6  ;;  %4204 = vmatpush3.bf16.msra.mxu1 %v4169_v6 }
 0xa4f   : > { %v4173_v53 = vpack.c.bf16 %v4920_v29, %v4922_v42  ;;  %v2005_v12 = vmul.f32 0.5, %v1974_v19 }
 0xa50   : > { %v4928_v21 = vsub.f32 %v1845_v17, %v2006_v49  ;;  %v4426_v17 = vmov 0.0|0.0   ;;  %v514_v49 = vpop.xlane.xlu1 %513 }
 0xa51   : > { %v4930_v22 = vsub.f32 %v1844_v41, %v2005_v12  ;;  %v3661_v25 = vpop.f32.mrb[78].mxu1  ;;  %4174 = vmatprep.subr.bf16.mxu0 %v4173_v53  ;;  %4206 = vmatprep.subr.bf16.mxu1 %v4173_v53  ;;  %v515_v19 = vrot.slane %v514_v49, 4 }
 0xa52   : > { %v2008_v61 = vmul.f32 0.5, %v3661_v25  ;;  %v1984_v35 = vpop.f32.mrb[79].mxu1  ;;  %4176 = vmatpush3.bf16.msra.mxu0 %v4173_v53  ;;  %4208 = vmatpush3.bf16.msra.mxu1 %v4173_v53 }
 0xa53   : > { %v4177_v20 = vpack.c.bf16 %v4928_v21, %v4930_v22  ;;  %v2007_v62 = vmul.f32 0.5, %v1984_v35  ;;  %v516_v53 = vadd.f32 %v515_v19, %v514_v49 }
 0xa54   : > { %v4936_v56 = vsub.f32 %v1847_v31, %v2008_v61 }
 0xa55   : > { %v4938_v34 = vsub.f32 %v1846_v1, %v2007_v62  ;;  %4178 = vmatprep.subr.bf16.mxu0 %v4177_v20  ;;  %4210 = vmatprep.subr.bf16.mxu1 %v4177_v20  ;;  %v517_v41 = vrot.slane %v516_v53, 2 }
 0xa56   : > { %4180 = vmatpush3.bf16.msra.mxu0 %v4177_v20  ;;  %4212 = vmatpush3.bf16.msra.mxu1 %v4177_v20 }
 0xa57   : > { %v4181_v10 = vpack.c.bf16 %v4936_v56, %v4938_v34  ;;  %v518_v12 = vadd.f32 %v517_v41, %v516_v53 }
 0xa59   : > { %4182 = vmatprep.subr.bf16.mxu0 %v4181_v10  ;;  %4214 = vmatprep.subr.bf16.mxu1 %v4181_v10  ;;  %v519_v25 = vrot.slane %v518_v12, 1 }
 0xa5a   : > { %4184 = vmatpush3.bf16.msra.mxu0 %v4181_v10  ;;  %4216 = vmatpush3.bf16.msra.mxu1 %v4181_v10 }
 0xa5b   : > { %4218 = vmatprep.subr.bf16.mxu0 %v4587_v46  ;;  %4249 = vmatprep.subr.bf16.mxu1 %v4426_v17  ;;  %v520_v31 = vadd.f32 %v519_v25, %v518_v12  ;;  %v2324_v12 = vmul.f32 1.5, %v4912_v60 }
 0xa5d   : > { %3695 = vmatmul.mubr.f32.vlgmr.msra.gmra.mrb[80].mxu0 %v4879_v3  ;;  %4322 = vrsqrt.f32 %v520_v31  ;;  %vm523_vm10 = vcmp.eq.f32.partialorder %v520_v31, inf  ;;  %v526_v1 = vand.u32 2147483648, %v520_v31  ;;  %vm525_vm11 = vcmp.eq.f32.partialorder %v520_v31, 0.0 }
 0xa5e   : > { %3697 = vmatprep.mubr.f32.mxu0 %v4890_v52  ;;  %4220 = vmatpush3.bf16.msra.mxu0 %v4587_v46 }
 0xa5f   : > { %4222 = vmatprep.subr.bf16.mxu0 %v4598_v63 }
 0xa61   : > { %3698 = vmatmul.mubr.f32.gmra.mrb[82].mxu0 %v4888_v54 }
 0xa62   : > { %3700 = vmatprep.mubr.f32.mxu0 %v4898_v2  ;;  %4224 = vmatpush3.bf16.msra.mxu0 %v4598_v63 }
 0xa63   : > { %4226 = vmatprep.subr.bf16.mxu0 %v4606_v16 }
 0xa65   : > { %3701 = vmatmul.mubr.f32.gmra.mrb[84].mxu0 %v4896_v37 }
 0xa66   : > { %3703 = vmatprep.mubr.f32.mxu0 %v4906_v15  ;;  %4228 = vmatpush3.bf16.msra.mxu0 %v4606_v16 }
 0xa67   : > { %4230 = vmatprep.subr.bf16.mxu0 %v4614_v28  ;;  %v4323_v61 = vpop.eup %4322 }
 0xa68   : > { %v522_v35 = vmul.f32 %v4323_v61, %v520_v31  ;;  %v2323_v61 = vmul.f32 1.5, %v4914_v30 }
 0xa69   : > { %3704 = vmatmul.mubr.f32.gmra.mrb[86].mxu0 %v4904_v0 }
 0xa6a   : > { %3706 = vmatprep.mubr.f32.mxu0 %v4914_v30  ;;  %4232 = vmatpush3.bf16.msra.mxu0 %v4614_v28  ;;  %v524_v20 = vsel %vm523_vm10, %v520_v31, %v522_v35 }
 0xa6b   : > { %4234 = vmatprep.subr.bf16.mxu0 %v4622_v40  ;;  %v527_v62 = vsel %vm525_vm11, %v526_v1, %v524_v20 }
 0xa6c   : > { %4324 = vrsqrt.f32 %v527_v62 }
 0xa6d   : > { %3707 = vmatmul.mubr.f32.gmra.mrb[88].mxu0 %v4912_v60 }
 0xa6e   : > { %3709 = vmatprep.mubr.f32.mxu0 %v4922_v42  ;;  %4236 = vmatpush3.bf16.msra.mxu0 %v4622_v40 }
 0xa6f   : > { %4238 = vmatprep.subr.bf16.mxu0 %v4630_v55 }
 0xa71   : > { %3710 = vmatmul.mubr.f32.gmra.mrb[90].mxu0 %v4920_v29 }
 0xa72   : > { %3712 = vmatprep.mubr.f32.mxu0 %v4930_v22  ;;  %4240 = vmatpush3.bf16.msra.mxu0 %v4630_v55 }
 0xa73   : > { %4242 = vmatprep.subr.bf16.mxu0 %v4638_v7 }
 0xa75   : > { %3713 = vmatmul.mubr.f32.gmra.mrb[92].mxu0 %v4928_v21 }
 0xa76   : > { %3715 = vmatprep.mubr.f32.mxu0 %v4938_v34  ;;  %4244 = vmatpush3.bf16.msra.mxu0 %v4638_v7 }
 0xa77   : > { %4246 = vmatprep.subr.bf16.mxu0 %v4646_v23 }
 0xa79   : > { %3716 = vmatmul.mubr.f32.gmra.mrb[94].mxu0 %v4936_v56 }
 0xa7a   : > { %4248 = vmatpush3.bf16.msra.mxu0 %v4646_v23 }
 0xb30   : > { %v3696_v46 = vpop.f32.mrb[80].mxu0 }
 0xb31   : > { %v2091_v63 = vpop.f32.mrb[81].mxu0 }
 0xb32   : > { %3750 = vmatprep.mubr.f32.mxu1 %v2091_v63 }
 0xb33   : > { %3751 = vmatmul.mubr.f32.vlgmr.msra.gmra.mrb[80].mxu1 %v3696_v46  ;;  %v2316_v46 = vmul.f32 1.5, %v4879_v3  ;;  %v2317_v3 = vmul.f32 1.5, %v4890_v52 }
 0xb34   : > { %v3699_v16 = vpop.f32.mrb[82].mxu0 }
 0xb35   : > { %v2101_v28 = vpop.f32.mrb[83].mxu0 }
 0xb36   : > { %3753 = vmatprep.mubr.f32.mxu1 %v2101_v28 }
 0xb37   : > { %3754 = vmatmul.mubr.f32.gmra.mrb[82].mxu1 %v3699_v16  ;;  %v2315_v16 = vmul.f32 1.5, %v4881_v11 }
 0xb38   : > { %v3702_v40 = vpop.f32.mrb[84].mxu0 }
 0xb39   : > { %v2111_v55 = vpop.f32.mrb[85].mxu0 }
 0xb3a   : > { %3756 = vmatprep.mubr.f32.mxu1 %v2111_v55  ;;  %v4977_v55 = vpop.eup %4324 }
 0xb3b   : > { %3757 = vmatmul.mubr.f32.gmra.mrb[84].mxu1 %v3702_v40 }
 0xb3c   : > { %v3705_v50 = vpop.f32.mrb[86].mxu0 }
 0xb3d   : > { %v2121_v7 = vpop.f32.mrb[87].mxu0 }
 0xb3e   : > { %3759 = vmatprep.mubr.f32.mxu1 %v2121_v7 }
 0xb3f   : > { %3760 = vmatmul.mubr.f32.gmra.mrb[86].mxu1 %v3705_v50 }
 0xb40   : > { %v3708_v36 = vpop.f32.mrb[88].mxu0 }
 0xb41   : > { %v2131_v47 = vpop.f32.mrb[89].mxu0 }
 0xb42   : > { %3762 = vmatprep.mubr.f32.mxu1 %v2131_v47  ;;  %v2318_v47 = vmul.f32 1.5, %v4888_v54  ;;  %v2319_v54 = vmul.f32 1.5, %v4898_v2 }
 0xb43   : > { %3763 = vmatmul.mubr.f32.gmra.mrb[88].mxu1 %v3708_v36 }
 0xb44   : > { %v3711_v23 = vpop.f32.mrb[90].mxu0 }
 0xb45   : > { %v2141_v45 = vpop.f32.mrb[91].mxu0 }
 0xb46   : > { %3765 = vmatprep.mubr.f32.mxu1 %v2141_v45 }
 0xb47   : > { %3766 = vmatmul.mubr.f32.gmra.mrb[90].mxu1 %v3711_v23 }
 0xb48   : > { %v3714_v13 = vpop.f32.mrb[92].mxu0 }
 0xb49   : > { %v2151_v14 = vpop.f32.mrb[93].mxu0 }
 0xb4a   : > { %3768 = vmatprep.mubr.f32.mxu1 %v2151_v14 }
 0xb4b   : > { %3769 = vmatmul.mubr.f32.gmra.mrb[92].mxu1 %v3714_v13 }
 0xb4c   : > { %v3717_v9 = vpop.f32.mrb[94].mxu0 }
 0xb4d   : > { %v2161_v48 = vpop.f32.mrb[95].mxu0 }
 0xb4e   : > { %3771 = vmatprep.mubr.f32.mxu1 %v2161_v48 }
 0xb4f   : > { %3772 = vmatmul.mubr.f32.gmra.mrb[94].mxu1 %v3717_v9 }
 0xb50   : > { %3862 = vmatprep.mubr.msk.f32.mxu1 %vm4427_vm9, %v4425_v5 }
 0xc06   : > { %v3752_v32 = vpop.f32.mrb[80].mxu1 }
 0xc07   : > { %v2236_v24 = vpop.f32.mrb[81].mxu1 }
 0xc08   : > { %3806 = vmatprep.mubr.f32.mxu0 %v2236_v24 }
 0xc09   : > { %3807 = vmatmul.mubr.f32.vlgmr.msra.gmra.mrb[96].mxu0 %v3752_v32 }
 0xc0a   : > { %v3755_v57 = vpop.f32.mrb[82].mxu1 }
 0xc0b   : > { %v2246_v26 = vpop.f32.mrb[83].mxu1 }
 0xc0c   : > { %3809 = vmatprep.mubr.f32.mxu0 %v2246_v26 }
 0xc0d   : > { %3810 = vmatmul.mubr.f32.gmra.mrb[98].mxu0 %v3755_v57  ;;  %v2320_v57 = vmul.f32 1.5, %v4896_v37 }
 0xc0e   : > { %v3758_v27 = vpop.f32.mrb[84].mxu1 }
 0xc0f   : > { %v2256_v58 = vpop.f32.mrb[85].mxu1 }
 0xc10   : > { %3812 = vmatprep.mubr.f32.mxu0 %v2256_v58 }
 0xc11   : > { %3813 = vmatmul.mubr.f32.gmra.mrb[100].mxu0 %v3758_v27 }
 0xc12   : > { %v3761_v18 = vpop.f32.mrb[86].mxu1 }
 0xc13   : > { %v2266_v44 = vpop.f32.mrb[87].mxu1 }
 0xc14   : > { %3815 = vmatprep.mubr.f32.mxu0 %v2266_v44 }
 0xc15   : > { %3816 = vmatmul.mubr.f32.gmra.mrb[102].mxu0 %v3761_v18 }
 0xc16   : > { %v3764_v33 = vpop.f32.mrb[88].mxu1 }
 0xc17   : > { %v2276_v4 = vpop.f32.mrb[89].mxu1 }
 0xc18   : > { %3818 = vmatprep.mubr.f32.mxu0 %v2276_v4 }
 0xc19   : > { %3819 = vmatmul.mubr.f32.gmra.mrb[104].mxu0 %v3764_v33 }
 0xc1a   : > { %v3767_v38 = vpop.f32.mrb[90].mxu1 }
 0xc1b   : > { %v2286_v39 = vpop.f32.mrb[91].mxu1 }
 0xc1c   : > { %3821 = vmatprep.mubr.f32.mxu0 %v2286_v39  ;;  %v2322_v39 = vmul.f32 1.5, %v4904_v0 }
 0xc1d   : > { %3822 = vmatmul.mubr.f32.gmra.mrb[106].mxu0 %v3767_v38 }
 0xc1e   : > { %v3770_v6 = vpop.f32.mrb[92].mxu1 }
 0xc1f   : > { %v2296_v43 = vpop.f32.mrb[93].mxu1 }
 0xc20   : > { %3824 = vmatprep.mubr.f32.mxu0 %v2296_v43 }
 0xc21   : > { %3825 = vmatmul.mubr.f32.gmra.mrb[108].mxu0 %v3770_v6 }
 0xc22   : > { %v3773_v59 = vpop.f32.mrb[94].mxu1 }
 0xc23   : > { %v2306_v51 = vpop.f32.mrb[95].mxu1 }
 0xc24   : > { %3827 = vmatprep.mubr.f32.mxu0 %v2306_v51 }
 0xc25   : > { %3828 = vmatmul.mubr.f32.gmra.mrb[110].mxu0 %v3773_v59  ;;  %v2321_v59 = vmul.f32 1.5, %v4906_v15 }
 0xcdc   : > { %v3808_v10 = vpop.f32.mrb[96].mxu0 }
 0xcdd   : > { %v2477_v5 = vmul.f32 0.5, %v3808_v10  ;;  %v2397_v63 = vpop.f32.mrb[97].mxu0 }
 0xcde   : > { %v2476_v28 = vmul.f32 0.5, %v2397_v63 }
 0xcdf   : > { %v2493_v40 = vsub.f32 %v2316_v46, %v2477_v5  ;;  %v2326_v46 = vmul.f32 1.5, %v4920_v29 }
 0xce0   : > { %v2492_v50 = vsub.f32 %v2315_v16, %v2476_v28  ;;  %v3811_v7 = vpop.f32.mrb[98].mxu0  ;;  %v2325_v16 = vmul.f32 1.5, %v4922_v42 }
 0xce1   : > { %v2510_v36 = vmul.f32 %v4977_v55, %v2493_v40  ;;  %v2479_v23 = vmul.f32 0.5, %v3811_v7  ;;  %v2407_v45 = vpop.f32.mrb[99].mxu0 }
 0xce2   : > { %v2509_v13 = vmul.f32 %v4977_v55, %v2492_v50  ;;  %v2478_v14 = vmul.f32 0.5, %v2407_v45 }
 0xce3   : > { %v2495_v9 = vsub.f32 %v2318_v47, %v2479_v23  ;;  %v2328_v47 = vmul.f32 1.5, %v4928_v21 }
 0xce4   : > { %v4250_v48 = vpack.c.bf16 %v2510_v36, %v2509_v13  ;;  %v2494_v11 = vsub.f32 %v2317_v3, %v2478_v14  ;;  %v3814_v32 = vpop.f32.mrb[100].mxu0  ;;  %v2327_v13 = vmul.f32 1.5, %v4930_v22 }
 0xce5   : > { %v2512_v24 = vmul.f32 %v4977_v55, %v2495_v9  ;;  %v2481_v26 = vmul.f32 0.5, %v3814_v32  ;;  %v2417_v27 = vpop.f32.mrb[101].mxu0  ;;  %v2330_v32 = vmul.f32 1.5, %v4936_v56 }
 0xce6   : > { %v2511_v58 = vmul.f32 %v4977_v55, %v2494_v11  ;;  %v2480_v18 = vmul.f32 0.5, %v2417_v27  ;;  %4251 = vmatpush3.bf16.msra.mxu1 %v4250_v48 }
 0xce7   : > { %v2497_v44 = vsub.f32 %v2320_v57, %v2481_v26  ;;  %4252 = vmatprep.subr.bf16.mxu1 %v4426_v17  ;;  %v2329_v26 = vmul.f32 1.5, %v4938_v34 }
 0xce8   : > { %v4253_v52 = vpack.c.bf16 %v2512_v24, %v2511_v58  ;;  %v2496_v33 = vsub.f32 %v2319_v54, %v2480_v18  ;;  %v3817_v4 = vpop.f32.mrb[102].mxu0 }
 0xce9   : > { %v2514_v38 = vmul.f32 %v4977_v55, %v2497_v44  ;;  %v2483_v6 = vmul.f32 0.5, %v3817_v4  ;;  %v2427_v37 = vpop.f32.mrb[103].mxu0 }
 0xcea   : > { %v2513_v43 = vmul.f32 %v4977_v55, %v2496_v33  ;;  %v2482_v51 = vmul.f32 0.5, %v2427_v37  ;;  %4254 = vmatpush3.bf16.msra.mxu1 %v4253_v52 }
 0xceb   : > { %v2499_v2 = vsub.f32 %v2322_v39, %v2483_v6  ;;  %4255 = vmatprep.subr.bf16.mxu1 %v4426_v17 }
 0xcec   : > { %v4256_v49 = vpack.c.bf16 %v2514_v38, %v2513_v43  ;;  %v2498_v19 = vsub.f32 %v2321_v59, %v2482_v51  ;;  %v3820_v53 = vpop.f32.mrb[104].mxu0 }
 0xced   : > { %v2516_v41 = vmul.f32 %v4977_v55, %v2499_v2  ;;  %v2485_v25 = vmul.f32 0.5, %v3820_v53  ;;  %v2437_v0 = vpop.f32.mrb[105].mxu0 }
 0xcee   : > { %v2515_v31 = vmul.f32 %v4977_v55, %v2498_v19  ;;  %v2484_v35 = vmul.f32 0.5, %v2437_v0  ;;  %4257 = vmatpush3.bf16.msra.mxu1 %v4256_v49 }
 0xcef   : > { %v2501_v15 = vsub.f32 %v2324_v12, %v2485_v25  ;;  %4258 = vmatprep.subr.bf16.mxu1 %v4426_v17 }
 0xcf0   : > { %v4259_v20 = vpack.c.bf16 %v2516_v41, %v2515_v31  ;;  %v2500_v1 = vsub.f32 %v2323_v61, %v2484_v35  ;;  %v3823_v62 = vpop.f32.mrb[106].mxu0 }
 0xcf1   : > { %v2518_v10 = vmul.f32 %v4977_v55, %v2501_v15  ;;  %v2487_v5 = vmul.f32 0.5, %v3823_v62  ;;  %v2447_v60 = vpop.f32.mrb[107].mxu0 }
 0xcf2   : > { %v2517_v63 = vmul.f32 %v4977_v55, %v2500_v1  ;;  %v2486_v28 = vmul.f32 0.5, %v2447_v60  ;;  %4260 = vmatpush3.bf16.msra.mxu1 %v4259_v20 }
 0xcf3   : > { %v2503_v30 = vsub.f32 %v2326_v46, %v2487_v5  ;;  %4261 = vmatprep.subr.bf16.mxu1 %v4426_v17 }
 0xcf4   : > { %v4262_v40 = vpack.c.bf16 %v2518_v10, %v2517_v63  ;;  %v2502_v50 = vsub.f32 %v2325_v16, %v2486_v28  ;;  %v3826_v7 = vpop.f32.mrb[108].mxu0 }
 0xcf5   : > { %v2520_v36 = vmul.f32 %v4977_v55, %v2503_v30  ;;  %v2489_v23 = vmul.f32 0.5, %v3826_v7  ;;  %v2457_v29 = vpop.f32.mrb[109].mxu0 }
 0xcf6   : > { %v2519_v45 = vmul.f32 %v4977_v55, %v2502_v50  ;;  %v2488_v3 = vmul.f32 0.5, %v2457_v29  ;;  %4263 = vmatpush3.bf16.msra.mxu1 %v4262_v40 }
 0xcf7   : > { %v2505_v42 = vsub.f32 %v2328_v47, %v2489_v23  ;;  %4264 = vmatprep.subr.bf16.mxu1 %v4426_v17 }
 0xcf8   : > { %v4265_v14 = vpack.c.bf16 %v2520_v36, %v2519_v45  ;;  %v2504_v9 = vsub.f32 %v2327_v13, %v2488_v3  ;;  %v3829_v48 = vpop.f32.mrb[110].mxu0 }
 0xcf9   : > { %v2522_v11 = vmul.f32 %v4977_v55, %v2505_v42  ;;  %v2491_v24 = vmul.f32 0.5, %v3829_v48  ;;  %v2467_v21 = vpop.f32.mrb[111].mxu0 }
 0xcfa   : > { %v2521_v57 = vmul.f32 %v4977_v55, %v2504_v9  ;;  %v2490_v22 = vmul.f32 0.5, %v2467_v21  ;;  %4266 = vmatpush3.bf16.msra.mxu1 %v4265_v14 }
 0xcfb   : > { %v2507_v27 = vsub.f32 %v2330_v32, %v2491_v24  ;;  %4267 = vmatprep.subr.bf16.mxu1 %v4426_v17 }
 0xcfc   : > { %v4268_v58 = vpack.c.bf16 %v2522_v11, %v2521_v57  ;;  %v2506_v54 = vsub.f32 %v2329_v26, %v2490_v22 }
 0xcfd   : > { %v2524_v18 = vmul.f32 %v4977_v55, %v2507_v27 }
 0xcfe   : > { %v2523_v56 = vmul.f32 %v4977_v55, %v2506_v54  ;;  %4269 = vmatpush3.bf16.msra.mxu1 %v4268_v58 }
 0xcff   : > { %4270 = vmatprep.subr.bf16.mxu1 %v4426_v17 }
 0xd00   : > { %v4271_v44 = vpack.c.bf16 %v2524_v18, %v2523_v56 }
 0xd02   : > { %4272 = vmatpush3.bf16.msra.mxu1 %v4271_v44 }
 0xd05   : > { %3863 = vmatmul.mubr.f32.vlgmr.msra.gmra.mrb[96].mxu1 %v4558_v8 }
 0xdd8   : > { %v2591_v34 = vpop.f32.mrb[96].mxu1 }
 0xdd9   : > { %2595 = vst [vmem:[%s131_s17] sm:$0xff] %v2591_v34  ;;  %v3864_v17 = vpop.f32.mrb[97].mxu1 }
 0xdda   : > { %4369 = shalt.err (!%p4366_p4)
}
 0xddb   : > { %s4370_s5 = scalar_lea.hbm %s5025_s29, 128  ;;  %s4374_s14 = scalar_lea.hbm %s5068_s1, 256 }
 0xddc   : > { %p4371_p5 = scmp.ne.s32.totalorder %s5025_s29, %s4370_s5  ;;  %p4375_p0 = scmp.lt.u32.totalorder %s5025_s29, %s5068_s1 }
 0xddd   : > { %p4376_p1 = scmp.lt.u32.totalorder %s4374_s14, %s4370_s5  ;;  %p4378_p6 = scmp.lt.u32.totalorder %s4370_s5, %s5025_s29 }
 0xdde   : > { %p4372_p8 = pnand %p4371_p5, %p5077_p11 }
 0xddf   : > { %p4377_p3 = por %p4376_p1, %p4375_p0 }
 0xde0   : > { %p4373_p9 = pneg %p4372_p8 }
 0xde1   : > { %p4379_p12 = por %p4378_p6, %p4377_p3 }
 0xde3   : > { %p4380_p13 = pnand %p4379_p12, %p4373_p9 }
 0xde5   : > { %4383 = shalt.err (!%p4380_p13)
}
 0xde6   : > { %4275 = dma.vmem_to_hbm [thread:$0]  (%p5077_p11), %s5020_s25, 128, %s5025_s29, %s2597_s30  }
 0xde7 PF: > { %s2622_s21 = sand.u32 1, %s4410_s6   ;;  %p5078_p7 = scmp.ne.s32.totalorder %s5073_s19, 0 }
 0xde8   : > { %p5079_p10 = scmp.ge.s32.totalorder %s4422_s9, 2  ;;  %s2623_s22 = scalar_lea.sflag [#allocation4], %s2622_s21 }
 0xdea   : > { %p4282_p2 = pnand %p5079_p10, %p5078_p7 }
 0xdec   : > { %4405 = dma.done.wait (!%p4282_p2), %s2623_s22, 128  }
 0xded   : > { %4407 = vsyncadd (!%p4282_p2), %s2623_s22, 4294967168  ;;  %p14_p4 = scmp.ge.s32.totalorder %s4464_s12, 4   ;;  %s5080_s6 = smov %s4414_s7 }
 0xdee   : > { %s5081_s7 = smov %s4418_s8  ;;  %s5082_s8 = smov %s4476_s15 }
 0xdef   : > { %s5083_s9 = smov %s4464_s12  ;;  %16 = sbr.rel (!%p14_p4) target bundleno = 5 (0x5), region = 69 }
 0xdf6   :  { %2628 = vsyncpa [#allocation3], 1 }
 0xdf7   :  { %2630 = vsyncpa [#allocation3 + $0x1], 1 }
 0xdf8   :  { %2631 = vsyncpa [#allocation4], 1 }
 0xdf9   :  { %2633 = vsyncpa [#allocation4 + $0x1], 1 }

</bundles_post_ra>
